<compile_context>
chip_gen: v5e
topology: v5e:2x2
jax: 0.10.0
libtpu: 0.0.40
codegen_flags: <defaults>
</compile_context>

<pallas_src>
import functools

import jax
import jax.numpy as jnp
from jax import lax
from jax.experimental import pallas as pl
from jax.experimental.pallas import tpu as pltpu

_EPS = 1e-5
_VMEM_LIMIT = 48 * 1024 * 1024   # below v7x's 64 MiB physical, above 32 MiB default


def _round_up(n, m):
    return ((n + m - 1) // m) * m


def _hw_tiling(hw, cap=512):
    """HW row-tile choice: largest multiple-of-8 divisor of hw that fits the
    VMEM-budget cap (no padding); else a lane-friendly tile plus padded length."""
    best = 0
    t = 8
    while t <= min(cap, hw):
        if hw % t == 0:
            best = t
        t += 8
    if best:
        return best, hw
    t = min(cap, max(8, _round_up(min(hw, 128), 8)))
    return t, _round_up(hw, t)


# -----------------------------------------------------------------------------
# Kernel 1: fused 3x3 conv (+BN+ReLU), 2-layer aux head, SpatialGather softmax
# and the f_object / f_down projections — everything that touches the raw input
# or the whole-image feats/aux maps, so none of them round-trip HBM twice.
#
# Input is the channel-major token matrix (Ch, (W+1) + H*W + (W+1)) padded with
# W+1 zero columns per side: token t = y*W + x lives at column (W+1)+t and its
# (dy,dx) neighbour at column (W+1)+t+dy*W+dx.  Horizontal wrap-around is zeroed
# once per dx on the input slice; vertical out-of-image reads land in the pad.
# -----------------------------------------------------------------------------
def _conv_aux_gather_kernel(x_ref, w3_ref, css_ref, aw1_ref, a1ss_ref, aw2_ref,
                            ab2_ref, wkv_ref, kvss_ref, wk2_ref, k2ss_ref,
                            f_ref, aux_ref, k_ref, v_ref, *, H, W):
    HW = H * W
    Ck = wk2_ref.shape[-1]
    xb = x_ref[0]                                      # (Ch, HW + 2W + 2) bf16
    cols = HW + 2 * W

    # Three dx-shifted slices, built and masked ONCE (on the narrow Ch-deep
    # input, not per-tap on the Cm-deep matmul result), reused across the three
    # dy offsets below.
    lidx = lax.broadcasted_iota(jnp.int32, (1, cols), 1) % W
    zero = jnp.zeros((), xb.dtype)
    s_m1 = jnp.where(lidx == 0, zero, xb[:, 0:cols])            # dx = -1
    s_0 = xb[:, 1:1 + cols]                                     # dx =  0
    s_p1 = jnp.where(lidx == W - 1, zero, xb[:, 2:2 + cols])    # dx = +1

    css = css_ref[...]                                 # (Cm, 2) folded BN affine
    Cm = css.shape[0]
    acc = jnp.zeros((Cm, HW), jnp.float32)
    # TODO(synk): optionally stack the 3 dx slices along the contraction axis
    # (weight (3*Ch, Cm)) for 3 wider dots / better MXU cadence at production Ch.
    for dyi in range(3):
        c0 = dyi * W
        for dxi, s in enumerate((s_m1, s_0, s_p1)):
            acc = acc + lax.dot_general(
                w3_ref[dyi * 3 + dxi], s[:, c0:c0 + HW],
                (((0,), (0,)), ((), ())),
                preferred_element_type=jnp.float32)            # (Cm, HW)
    feats = jnp.maximum(acc * css[:, 0:1] + css[:, 1:2], 0.0)
    feats_b = feats.astype(jnp.bfloat16)
    f_ref[0] = feats_b                                          # lane-dense store

    # aux_head (Conv1x1+BN+ReLU ; Conv1x1+bias) on the centre-tap tokens,
    # produced directly in (K, HW) layout (lane dense, NCHW-ready).
    center = s_0[:, W:W + HW]                          # (Ch, HW), unshifted tokens
    a1ss = a1ss_ref[...]
    a1 = lax.dot_general(aw1_ref[...], center, (((0,), (0,)), ((), ())),
                         preferred_element_type=jnp.float32)    # (Ch, HW)
    a1 = jnp.maximum(a1 * a1ss[:, 0:1] + a1ss[:, 1:2], 0.0)
    aux_t = lax.dot_general(aw2_ref[...], a1.astype(jnp.bfloat16),
                            (((0,), (0,)), ((), ())),
                            preferred_element_type=jnp.float32)  # (K, HW)
    aux_t = aux_t + ab2_ref[...]                       # bias (K, 1)
    aux_ref[0] = aux_t

    # SpatialGather (fused): per-class softmax over HW contracted with feats —
    # feats never re-reads HBM for the gather.  Exact divide (tiny, cold path).
    cmax = jnp.max(aux_t, axis=1, keepdims=True)
    e = jnp.exp(aux_t - cmax)                          # (K, HW) f32
    den = jnp.sum(e, axis=1, keepdims=True)            # (K, 1)
    ctx = lax.dot_general(e.astype(jnp.bfloat16), feats_b,
                          (((1,), (1,)), ((), ())),
                          preferred_element_type=jnp.float32) / den   # (K, Cm)
    ctx_b = ctx.astype(jnp.bfloat16)

    # f_object(stage 1) + f_down share the context input -> one packed weight.
    kvss = kvss_ref[...]
    kv = jnp.dot(ctx_b, wkv_ref[...], preferred_element_type=jnp.float32)
    kv = jnp.maximum(kv * kvss[0:1, :] + kvss[1:2, :], 0.0)     # (K, 2*Ck)
    k2ss = k2ss_ref[...]
    k2 = jnp.dot(kv[:, :Ck].astype(jnp.bfloat16), wk2_ref[...],
                 preferred_element_type=jnp.float32)
    k2 = jnp.maximum(k2 * k2ss[0:1, :] + k2ss[1:2, :], 0.0)
    k_ref[0] = k2.astype(k_ref.dtype)
    v_ref[0] = kv[:, Ck:].astype(v_ref.dtype)


def conv_aux_gather(xpad, p, H, W):
    B, Ch, L = xpad.shape
    HW = H * W
    Cm = p["w3"].shape[-1]
    Ck = p["w_k2"].shape[-1]
    K = p["aux_w2"].shape[-1]
    kernel = functools.partial(_conv_aux_gather_kernel, H=H, W=W)
    # TODO(synk): at production resolutions tile the token axis with a W+1 halo
    # (manual DMA) and switch the fused gather to online-softmax accumulation;
    # one whole-image block per batch element is only viable at small H*W.
    return pl.pallas_call(
        kernel,
        out_shape=(jax.ShapeDtypeStruct((B, Cm, HW), jnp.bfloat16),
                   jax.ShapeDtypeStruct((B, K, HW), jnp.float32),
                   jax.ShapeDtypeStruct((B, K, Ck), jnp.bfloat16),
                   jax.ShapeDtypeStruct((B, K, Ck), jnp.bfloat16)),
        grid_spec=pltpu.PrefetchScalarGridSpec(
            num_scalar_prefetch=0,
            grid=(B,),
            in_specs=[
                pl.BlockSpec((1, Ch, L), lambda b: (b, 0, 0)),
                pl.BlockSpec((9, Ch, Cm), lambda b: (0, 0, 0)),
                pl.BlockSpec((Cm, 2), lambda b: (0, 0)),
                pl.BlockSpec((Ch, Ch), lambda b: (0, 0)),
                pl.BlockSpec((Ch, 2), lambda b: (0, 0)),
                pl.BlockSpec((Ch, K), lambda b: (0, 0)),
                pl.BlockSpec((K, 1), lambda b: (0, 0)),
                pl.BlockSpec((Cm, 2 * Ck), lambda b: (0, 0)),
                pl.BlockSpec((2, 2 * Ck), lambda b: (0, 0)),
                pl.BlockSpec((Ck, Ck), lambda b: (0, 0)),
                pl.BlockSpec((2, Ck), lambda b: (0, 0)),
            ],
            out_specs=[pl.BlockSpec((1, Cm, HW), lambda b: (b, 0, 0)),
                       pl.BlockSpec((1, K, HW), lambda b: (b, 0, 0)),
                       pl.BlockSpec((1, K, Ck), lambda b: (b, 0, 0)),
                       pl.BlockSpec((1, K, Ck), lambda b: (b, 0, 0))],
        ),
        compiler_params=pltpu.CompilerParams(
            dimension_semantics=("parallel",),
            vmem_limit_bytes=_VMEM_LIMIT),
    )(xpad, p["w3"], p["c_ss"], p["aux_w1"], p["a1_ss"], p["aux_w2"],
      p["aux_b2"], p["w_kv"], p["kv_ss"], p["w_k2"], p["k2_ss"])


# -----------------------------------------------------------------------------
# Kernel 2: ObjectAttentionBlock2D core (f_pixel + attention over K regions)
# + f_up + conv_bn_dropout (concat-free) + cls_head, channel-major, tiled over
# (B, HW tiles); both grid axes "parallel" (megacore / 2-TC friendly).
# -----------------------------------------------------------------------------
def _distri_cls_kernel(f_ref, k_ref, v_ref, wq1_ref, q1ss_ref, wq2_ref, q2ss_ref,
                       wup_ref, upss_ref, wcbd_ref, cbdss_ref, wcls_ref, clsb_ref,
                       ocr_ref, cls_ref):
    feats = f_ref[0]                                   # (Cm, tq) bf16
    Cm = feats.shape[0]

    # f_pixel: two Conv1x1(no bias)+BN+ReLU.  NOTE: key_channels**-0.5 is folded
    # into the 2nd BN affine (scale AND shift); this commutes with the ReLU only
    # because the folded constant is positive.
    q1ss = q1ss_ref[...]
    q = lax.dot_general(wq1_ref[...], feats, (((0,), (0,)), ((), ())),
                        preferred_element_type=jnp.float32)       # (Ck, tq)
    q = jnp.maximum(q * q1ss[:, 0:1] + q1ss[:, 1:2], 0.0)
    q2ss = q2ss_ref[...]
    q = lax.dot_general(wq2_ref[...], q.astype(jnp.bfloat16),
                        (((0,), (0,)), ((), ())),
                        preferred_element_type=jnp.float32)
    q = jnp.maximum(q * q2ss[:, 0:1] + q2ss[:, 1:2], 0.0)         # (Ck, tq)

    # attention over the K object-region vectors; softmax over the (sublane) K
    # axis, approx EUP reciprocal on the hot path.
    sim = lax.dot_general(k_ref[0], q.astype(jnp.bfloat16),
                          (((1,), (0,)), ((), ())),
                          preferred_element_type=jnp.float32)     # (K, tq)
    sim = sim - jnp.max(sim, axis=0, keepdims=True)
    e = jnp.exp(sim)
    sm = e * pl.reciprocal(jnp.sum(e, axis=0, keepdims=True), approx=True)
    ctx = lax.dot_general(v_ref[0], sm.astype(jnp.bfloat16),
                          (((0,), (0,)), ((), ())),
                          preferred_element_type=jnp.float32)     # (Ck, tq)

    # f_up
    upss = upss_ref[...]
    up = lax.dot_general(wup_ref[...], ctx.astype(jnp.bfloat16),
                         (((0,), (0,)), ((), ())),
                         preferred_element_type=jnp.float32)      # (Cm, tq)
    up = jnp.maximum(up * upss[:, 0:1] + upss[:, 1:2], 0.0)

    # conv_bn_dropout on concat([up, feats]) without materializing the concat
    # (Dropout2d(0.05) is identity in eval).
    wcbd = wcbd_ref[...]                                          # (2*Cm, Cm)
    h = lax.dot_general(wcbd[0:Cm, :], up.astype(jnp.bfloat16),
                        (((0,), (0,)), ((), ())),
                        preferred_element_type=jnp.float32)
    h = h + lax.dot_general(wcbd[Cm:2 * Cm, :], feats,
                            (((0,), (0,)), ((), ())),
                            preferred_element_type=jnp.float32)
    cbdss = cbdss_ref[...]
    ocr = jnp.maximum(h * cbdss[:, 0:1] + cbdss[:, 1:2], 0.0)     # (Cm, tq)
    ocr_ref[0] = ocr                                              # lane-dense

    # cls_head — produced directly in (K, tq): lane-dense, NCHW-ready.
    cls = lax.dot_general(wcls_ref[...], ocr.astype(jnp.bfloat16),
                          (((0,), (0,)), ((), ())),
                          preferred_element_type=jnp.float32)     # (K, tq)
    cls_ref[0] = cls + clsb_ref[...]


def distri_and_cls(feats_t, kmat, vmat, p, *, hw_tile_cap=512):
    B, Cm, HW = feats_t.shape
    Ck = kmat.shape[-1]
    K = p["w_cls"].shape[-1]
    tq, HWp = _hw_tiling(HW, cap=hw_tile_cap)          # capped for v7x's 64 MiB VMEM
    if HWp != HW:
        feats_t = jnp.pad(feats_t, ((0, 0), (0, 0), (0, HWp - HW)))
    n_q = HWp // tq

    def wspec(r, c):
        return pl.BlockSpec((r, c), lambda b, i: (0, 0))

    ocr_t, cls_t = pl.pallas_call(
        _distri_cls_kernel,
        out_shape=(jax.ShapeDtypeStruct((B, Cm, HWp), jnp.float32),
                   jax.ShapeDtypeStruct((B, K, HWp), jnp.float32)),
        grid_spec=pltpu.PrefetchScalarGridSpec(
            num_scalar_prefetch=0,
            grid=(B, n_q),
            in_specs=[
                pl.BlockSpec((1, Cm, tq), lambda b, i: (b, 0, i)),
                pl.BlockSpec((1, K, Ck), lambda b, i: (b, 0, 0)),
                pl.BlockSpec((1, K, Ck), lambda b, i: (b, 0, 0)),
                wspec(Cm, Ck), wspec(Ck, 2),
                wspec(Ck, Ck), wspec(Ck, 2),
                wspec(Ck, Cm), wspec(Cm, 2),
                wspec(2 * Cm, Cm), wspec(Cm, 2),
                wspec(Cm, K), wspec(K, 1),
            ],
            out_specs=[pl.BlockSpec((1, Cm, tq), lambda b, i: (b, 0, i)),
                       pl.BlockSpec((1, K, tq), lambda b, i: (b, 0, i))],
        ),
        compiler_params=pltpu.CompilerParams(
            dimension_semantics=("parallel", "parallel"),
            vmem_limit_bytes=_VMEM_LIMIT),
    )(feats_t, kmat, vmat, p["w_q1"], p["q1_ss"], p["w_q2"], p["q2_ss"],
      p["w_up"], p["up_ss"], p["w_cbd"], p["cbd_ss"], p["w_cls"], p["b_cls"])
    if HWp != HW:
        ocr_t = ocr_t[:, :, :HW]
        cls_t = cls_t[:, :, :HW]
    return ocr_t, cls_t


# -----------------------------------------------------------------------------
# Parameter construction (deterministic, synthetic).  BN running stats (+ conv
# bias where present) are folded into per-channel (scale, shift) packs; matmul
# weights are bf16, affines f32.  Row packs (2, C) feed (rows, C) activations,
# column packs (C, 2) feed channel-major (C, cols) activations.
# -----------------------------------------------------------------------------
def _fold_bn(gamma, beta, mean, var, conv_bias=None):
    scale = gamma / jnp.sqrt(var + _EPS)
    shift = beta - mean * scale
    if conv_bias is not None:
        shift = shift + scale * conv_bias
    return scale, shift


def _bn_params(key, c):
    k1, k2, k3, k4 = jax.random.split(key, 4)
    gamma = 1.0 + 0.05 * jax.random.normal(k1, (c,), jnp.float32)
    beta = 0.05 * jax.random.normal(k2, (c,), jnp.float32)
    mean = 0.05 * jax.random.normal(k3, (c,), jnp.float32)
    var = 0.5 + jax.random.uniform(k4, (c,), jnp.float32)
    return gamma, beta, mean, var


def _pack_rows(scale, shift):        # (2, C)
    return jnp.stack([scale, shift], axis=0).astype(jnp.float32)


def _pack_cols(scale, shift):        # (C, 2)
    return jnp.stack([scale, shift], axis=1).astype(jnp.float32)


def init_params(key, high_level_ch, mid_channels, key_channels, num_classes):
    Ch, Cm, Ck, K = high_level_ch, mid_channels, key_channels, num_classes
    ks = iter(jax.random.split(key, 64))
    p = {}

    def w(shape, std=0.1):
        return std * jax.random.normal(next(ks), shape, jnp.float32)

    # conv3x3_ocr: Conv2d(Ch->Cm, 3x3, bias=True) + BN + ReLU (tap-major weight)
    b3 = w((Cm,))
    p["w3"] = w((9, Ch, Cm)).astype(jnp.bfloat16)
    p["c_ss"] = _pack_cols(*_fold_bn(*_bn_params(next(ks), Cm), conv_bias=b3))

    # aux_head: Conv1x1(Ch->Ch, bias) + BN + ReLU ; Conv1x1(Ch->K, bias)
    ab1 = w((Ch,))
    p["aux_w1"] = w((Ch, Ch)).astype(jnp.bfloat16)
    p["a1_ss"] = _pack_cols(*_fold_bn(*_bn_params(next(ks), Ch), conv_bias=ab1))
    p["aux_w2"] = w((Ch, K)).astype(jnp.bfloat16)
    p["aux_b2"] = w((K,)).reshape(K, 1)

    def proj(cin, cout, extra_scale=1.0):
        ww = w((cin, cout)).astype(jnp.bfloat16)
        s, sh = _fold_bn(*_bn_params(next(ks), cout))
        return ww, s * extra_scale, sh * extra_scale

    # f_pixel (q): key_channels**-0.5 folded into the 2nd affine (positive const,
    # so it commutes with the ReLU).
    wq1, s, sh = proj(Cm, Ck)
    p["w_q1"], p["q1_ss"] = wq1, _pack_cols(s, sh)
    wq2, s, sh = proj(Ck, Ck, extra_scale=float(Ck) ** -0.5)
    p["w_q2"], p["q2_ss"] = wq2, _pack_cols(s, sh)

    # f_object stage 1 + f_down share the (K, Cm) context input -> packed weight.
    wk1, sk, shk = proj(Cm, Ck)
    wv, sv, shv = proj(Cm, Ck)
    p["w_kv"] = jnp.concatenate([wk1, wv], axis=1)
    p["kv_ss"] = _pack_rows(jnp.concatenate([sk, sv]), jnp.concatenate([shk, shv]))
    wk2, s, sh = proj(Ck, Ck)
    p["w_k2"], p["k2_ss"] = wk2, _pack_rows(s, sh)

    wup, s, sh = proj(Ck, Cm)
    p["w_up"], p["up_ss"] = wup, _pack_cols(s, sh)
    wcbd, s, sh = proj(2 * Cm, Cm)       # conv_bn_dropout (dropout eval = identity)
    p["w_cbd"], p["cbd_ss"] = wcbd, _pack_cols(s, sh)

    # cls_head: Conv1x1(Cm->K, bias=True)
    p["w_cls"] = w((Cm, K)).astype(jnp.bfloat16)
    p["b_cls"] = w((K,)).reshape(K, 1)
    return p


# -----------------------------------------------------------------------------
# OCR_block forward
# -----------------------------------------------------------------------------
def ocr_block_forward(x_nchw, params):
    B, Ch, H, W = x_nchw.shape
    HW = H * W
    Cm = params["w3"].shape[-1]
    K = params["w_cls"].shape[-1]

    # Channel-major token layout straight from NCHW (no wrapper transpose); cast
    # to bf16 once; pad W+1 zero token-columns per side so every 3x3 tap of token
    # t is a shifted column window.
    x_cm = x_nchw.reshape(B, Ch, HW).astype(jnp.bfloat16)
    xpad = jnp.pad(x_cm, ((0, 0), (0, 0), (W + 1, W + 1)))

    feats_t, aux_t, kmat, vmat = conv_aux_gather(xpad, params, H, W)
    ocr_t, cls_t = distri_and_cls(feats_t, kmat, vmat, params)

    # Outputs are already channel-major; only free reshapes remain.
    cls_out = cls_t.reshape(B, K, H, W)
    aux_out = aux_t.reshape(B, K, H, W)
    ocr_feats = ocr_t.reshape(B, Cm, H, W)
    return cls_out, aux_out, ocr_feats


# -----------------------------------------------------------------------------
if __name__ == "__main__":
    B, HIGH_LEVEL_CH, H, W = 2, 8, 16, 16
    MID_CHANNELS, KEY_CHANNELS, NUM_CLASSES = 32, 16, 8

    root = jax.random.PRNGKey(0)
    k_in, k_par = jax.random.split(root)
    x = jax.random.normal(k_in, (B, HIGH_LEVEL_CH, H, W), jnp.float32)
    params = init_params(k_par, HIGH_LEVEL_CH, MID_CHANNELS, KEY_CHANNELS, NUM_CLASSES)

    fwd = jax.jit(ocr_block_forward)
    cls_out, aux_out, ocr_feats = fwd(x, params)
    jax.block_until_ready((cls_out, aux_out, ocr_feats))

    assert cls_out.shape == (B, NUM_CLASSES, H, W)
    assert aux_out.shape == (B, NUM_CLASSES, H, W)
    assert ocr_feats.shape == (B, MID_CHANNELS, H, W)
    assert bool(jnp.all(jnp.isfinite(cls_out)))
    assert bool(jnp.all(jnp.isfinite(aux_out)))
    assert bool(jnp.all(jnp.isfinite(ocr_feats)))
    print("KERNEL_OK")
</pallas_src>

<mosaic_0001>
module attributes {stable_mosaic.version = 11 : i64} {
  func.func @_conv_aux_gather_kernel(%arg0: i32, %arg1: memref<1x8x290xbf16, #tpu.memory_space<vmem>>, %arg2: memref<9x8x32xbf16, #tpu.memory_space<vmem>>, %arg3: memref<32x2xf32, #tpu.memory_space<vmem>>, %arg4: memref<8x8xbf16, #tpu.memory_space<vmem>>, %arg5: memref<8x2xf32, #tpu.memory_space<vmem>>, %arg6: memref<8x8xbf16, #tpu.memory_space<vmem>>, %arg7: memref<8x1xf32, #tpu.memory_space<vmem>>, %arg8: memref<32x32xbf16, #tpu.memory_space<vmem>>, %arg9: memref<2x32xf32, #tpu.memory_space<vmem>>, %arg10: memref<16x16xbf16, #tpu.memory_space<vmem>>, %arg11: memref<2x16xf32, #tpu.memory_space<vmem>>, %arg12: memref<1x32x256xbf16, #tpu.memory_space<vmem>>, %arg13: memref<1x8x256xf32, #tpu.memory_space<vmem>>, %arg14: memref<1x8x16xbf16, #tpu.memory_space<vmem>>, %arg15: memref<1x8x16xbf16, #tpu.memory_space<vmem>>) attributes {dimension_semantics = [#tpu.dimension_semantics<parallel>], iteration_bounds = array<i64: 2>, scalar_prefetch = 0 : i64, scratch_operands = 0 : i64, tpu.core_type = #tpu.core_type<tc>, window_params = [{transform_indices = @transform_0, window_bounds = array<i64: 1, 8, 290>}, {pipeline_mode = #tpu.pipeline_mode<synchronous>, transform_indices = @transform_1, window_bounds = array<i64: 9, 8, 32>}, {pipeline_mode = #tpu.pipeline_mode<synchronous>, transform_indices = @transform_2, window_bounds = array<i64: 32, 2>}, {pipeline_mode = #tpu.pipeline_mode<synchronous>, transform_indices = @transform_3, window_bounds = array<i64: 8, 8>}, {pipeline_mode = #tpu.pipeline_mode<synchronous>, transform_indices = @transform_4, window_bounds = array<i64: 8, 2>}, {pipeline_mode = #tpu.pipeline_mode<synchronous>, transform_indices = @transform_5, window_bounds = array<i64: 8, 8>}, {pipeline_mode = #tpu.pipeline_mode<synchronous>, transform_indices = @transform_6, window_bounds = array<i64: 8, 1>}, {pipeline_mode = #tpu.pipeline_mode<synchronous>, transform_indices = @transform_7, window_bounds = array<i64: 32, 32>}, {pipeline_mode = #tpu.pipeline_mode<synchronous>, transform_indices = @transform_8, window_bounds = array<i64: 2, 32>}, {pipeline_mode = #tpu.pipeline_mode<synchronous>, transform_indices = @transform_9, window_bounds = array<i64: 16, 16>}, {pipeline_mode = #tpu.pipeline_mode<synchronous>, transform_indices = @transform_10, window_bounds = array<i64: 2, 16>}, {transform_indices = @transform_11, window_bounds = array<i64: 1, 32, 256>}, {transform_indices = @transform_12, window_bounds = array<i64: 1, 8, 256>}, {transform_indices = @transform_13, window_bounds = array<i64: 1, 8, 16>}, {transform_indices = @transform_14, window_bounds = array<i64: 1, 8, 16>}]} {
    %c0 = arith.constant 0 : index
    %c0_0 = arith.constant 0 : index
    %c0_1 = arith.constant 0 : index
    %0 = vector.load %arg1[%c0, %c0_0, %c0_1] : memref<1x8x290xbf16, #tpu.memory_space<vmem>>, vector<1x8x290xbf16>
    %1 = vector.shape_cast %0 : vector<1x8x290xbf16> to vector<8x290xbf16>
    %2 = tpu.iota {dimensions = array<i32: 1>} : vector<1x288xi32>
    %c16_i32 = arith.constant 16 : i32
    %c0_i32 = arith.constant 0 : i32
    %3 = arith.cmpi eq, %c16_i32, %c0_i32 : i32
    %c1_i32 = arith.constant 1 : i32
    %4 = arith.select %3, %c1_i32, %c16_i32 : i32
    %5 = vector.broadcast %4 : i32 to vector<1x288xi32>
    %6 = arith.remsi %2, %5 : vector<1x288xi32>
    %c0_i32_2 = arith.constant 0 : i32
    %7 = vector.broadcast %c0_i32_2 : i32 to vector<1x288xi32>
    %8 = arith.cmpi ne, %6, %7 : vector<1x288xi32>
    %c0_i32_3 = arith.constant 0 : i32
    %9 = vector.broadcast %c0_i32_3 : i32 to vector<1x288xi32>
    %10 = arith.cmpi slt, %6, %9 : vector<1x288xi32>
    %c0_i32_4 = arith.constant 0 : i32
    %11 = arith.cmpi slt, %4, %c0_i32_4 : i32
    %12 = vector.broadcast %11 : i1 to vector<1x288xi1>
    %13 = vector.broadcast %12 : vector<1x288xi1> to vector<1x288xi1>
    %14 = arith.xori %10, %13 : vector<1x288xi1>
    %15 = arith.andi %14, %8 : vector<1x288xi1>
    %16 = vector.broadcast %4 : i32 to vector<1x288xi32>
    %17 = arith.addi %6, %16 : vector<1x288xi32>
    %18 = arith.select %15, %17, %6 : vector<1x288xi1>, vector<1x288xi32>
    %c0_i32_5 = arith.constant 0 : i32
    %19 = vector.broadcast %c0_i32_5 : i32 to vector<1x288xi32>
    %20 = arith.cmpi eq, %18, %19 : vector<1x288xi32>
    %21 = vector.extract_strided_slice %1 {offsets = [0, 0], sizes = [8, 288], strides = [1, 1]} : vector<8x290xbf16> to vector<8x288xbf16>
    %cst = arith.constant 0.000000e+00 : bf16
    %22 = vector.shape_cast %20 : vector<1x288xi1> to vector<1x288xi1>
    %23 = vector.broadcast %22 : vector<1x288xi1> to vector<8x288xi1>
    %24 = vector.broadcast %cst : bf16 to vector<8x288xbf16>
    %25 = arith.select %23, %24, %21 : vector<8x288xi1>, vector<8x288xbf16>
    %26 = vector.extract_strided_slice %1 {offsets = [0, 1], sizes = [8, 288], strides = [1, 1]} : vector<8x290xbf16> to vector<8x288xbf16>
    %c15_i32 = arith.constant 15 : i32
    %27 = vector.broadcast %c15_i32 : i32 to vector<1x288xi32>
    %28 = arith.cmpi eq, %18, %27 : vector<1x288xi32>
    %29 = vector.extract_strided_slice %1 {offsets = [0, 2], sizes = [8, 288], strides = [1, 1]} : vector<8x290xbf16> to vector<8x288xbf16>
    %cst_6 = arith.constant 0.000000e+00 : bf16
    %30 = vector.shape_cast %28 : vector<1x288xi1> to vector<1x288xi1>
    %31 = vector.broadcast %30 : vector<1x288xi1> to vector<8x288xi1>
    %32 = vector.broadcast %cst_6 : bf16 to vector<8x288xbf16>
    %33 = arith.select %31, %32, %29 : vector<8x288xi1>, vector<8x288xbf16>
    %c0_7 = arith.constant 0 : index
    %c0_8 = arith.constant 0 : index
    %34 = vector.load %arg3[%c0_7, %c0_8] : memref<32x2xf32, #tpu.memory_space<vmem>>, vector<32x2xf32>
    %cst_9 = arith.constant 0.000000e+00 : f32
    %35 = vector.broadcast %cst_9 : f32 to vector<32x256xf32>
    %c0_10 = arith.constant 0 : index
    %c0_11 = arith.constant 0 : index
    %c0_12 = arith.constant 0 : index
    %36 = vector.load %arg2[%c0_10, %c0_11, %c0_12] : memref<9x8x32xbf16, #tpu.memory_space<vmem>>, vector<1x8x32xbf16>
    %37 = vector.shape_cast %36 : vector<1x8x32xbf16> to vector<8x32xbf16>
    %38 = vector.extract_strided_slice %25 {offsets = [0, 0], sizes = [8, 256], strides = [1, 1]} : vector<8x288xbf16> to vector<8x256xbf16>
    %cst_13 = arith.constant dense<0.000000e+00> : vector<32x256xf32>
    %39 = tpu.matmul %37, %38, %cst_13 {dimension_numbers = #tpu.dot_dimension_numbers<[0], [0], [1], [1], [0, 1, 1, 1], [], []>} : vector<8x32xbf16>, vector<8x256xbf16>, vector<32x256xf32> -> vector<32x256xf32>
    %40 = arith.addf %35, %39 : vector<32x256xf32>
    %c1 = arith.constant 1 : index
    %c0_14 = arith.constant 0 : index
    %c0_15 = arith.constant 0 : index
    %41 = vector.load %arg2[%c1, %c0_14, %c0_15] : memref<9x8x32xbf16, #tpu.memory_space<vmem>>, vector<1x8x32xbf16>
    %42 = vector.shape_cast %41 : vector<1x8x32xbf16> to vector<8x32xbf16>
    %43 = vector.extract_strided_slice %26 {offsets = [0, 0], sizes = [8, 256], strides = [1, 1]} : vector<8x288xbf16> to vector<8x256xbf16>
    %cst_16 = arith.constant dense<0.000000e+00> : vector<32x256xf32>
    %44 = tpu.matmul %42, %43, %cst_16 {dimension_numbers = #tpu.dot_dimension_numbers<[0], [0], [1], [1], [0, 1, 1, 1], [], []>} : vector<8x32xbf16>, vector<8x256xbf16>, vector<32x256xf32> -> vector<32x256xf32>
    %45 = arith.addf %40, %44 : vector<32x256xf32>
    %c2 = arith.constant 2 : index
    %c0_17 = arith.constant 0 : index
    %c0_18 = arith.constant 0 : index
    %46 = vector.load %arg2[%c2, %c0_17, %c0_18] : memref<9x8x32xbf16, #tpu.memory_space<vmem>>, vector<1x8x32xbf16>
    %47 = vector.shape_cast %46 : vector<1x8x32xbf16> to vector<8x32xbf16>
    %48 = vector.extract_strided_slice %33 {offsets = [0, 0], sizes = [8, 256], strides = [1, 1]} : vector<8x288xbf16> to vector<8x256xbf16>
    %cst_19 = arith.constant dense<0.000000e+00> : vector<32x256xf32>
    %49 = tpu.matmul %47, %48, %cst_19 {dimension_numbers = #tpu.dot_dimension_numbers<[0], [0], [1], [1], [0, 1, 1, 1], [], []>} : vector<8x32xbf16>, vector<8x256xbf16>, vector<32x256xf32> -> vector<32x256xf32>
    %50 = arith.addf %45, %49 : vector<32x256xf32>
    %c3 = arith.constant 3 : index
    %c0_20 = arith.constant 0 : index
    %c0_21 = arith.constant 0 : index
    %51 = vector.load %arg2[%c3, %c0_20, %c0_21] : memref<9x8x32xbf16, #tpu.memory_space<vmem>>, vector<1x8x32xbf16>
    %52 = vector.shape_cast %51 : vector<1x8x32xbf16> to vector<8x32xbf16>
    %53 = vector.extract_strided_slice %25 {offsets = [0, 16], sizes = [8, 256], strides = [1, 1]} : vector<8x288xbf16> to vector<8x256xbf16>
    %cst_22 = arith.constant dense<0.000000e+00> : vector<32x256xf32>
    %54 = tpu.matmul %52, %53, %cst_22 {dimension_numbers = #tpu.dot_dimension_numbers<[0], [0], [1], [1], [0, 1, 1, 1], [], []>} : vector<8x32xbf16>, vector<8x256xbf16>, vector<32x256xf32> -> vector<32x256xf32>
    %55 = arith.addf %50, %54 : vector<32x256xf32>
    %c4 = arith.constant 4 : index
    %c0_23 = arith.constant 0 : index
    %c0_24 = arith.constant 0 : index
    %56 = vector.load %arg2[%c4, %c0_23, %c0_24] : memref<9x8x32xbf16, #tpu.memory_space<vmem>>, vector<1x8x32xbf16>
    %57 = vector.shape_cast %56 : vector<1x8x32xbf16> to vector<8x32xbf16>
    %58 = vector.extract_strided_slice %26 {offsets = [0, 16], sizes = [8, 256], strides = [1, 1]} : vector<8x288xbf16> to vector<8x256xbf16>
    %cst_25 = arith.constant dense<0.000000e+00> : vector<32x256xf32>
    %59 = tpu.matmul %57, %58, %cst_25 {dimension_numbers = #tpu.dot_dimension_numbers<[0], [0], [1], [1], [0, 1, 1, 1], [], []>} : vector<8x32xbf16>, vector<8x256xbf16>, vector<32x256xf32> -> vector<32x256xf32>
    %60 = arith.addf %55, %59 : vector<32x256xf32>
    %c5 = arith.constant 5 : index
    %c0_26 = arith.constant 0 : index
    %c0_27 = arith.constant 0 : index
    %61 = vector.load %arg2[%c5, %c0_26, %c0_27] : memref<9x8x32xbf16, #tpu.memory_space<vmem>>, vector<1x8x32xbf16>
    %62 = vector.shape_cast %61 : vector<1x8x32xbf16> to vector<8x32xbf16>
    %63 = vector.extract_strided_slice %33 {offsets = [0, 16], sizes = [8, 256], strides = [1, 1]} : vector<8x288xbf16> to vector<8x256xbf16>
    %cst_28 = arith.constant dense<0.000000e+00> : vector<32x256xf32>
    %64 = tpu.matmul %62, %63, %cst_28 {dimension_numbers = #tpu.dot_dimension_numbers<[0], [0], [1], [1], [0, 1, 1, 1], [], []>} : vector<8x32xbf16>, vector<8x256xbf16>, vector<32x256xf32> -> vector<32x256xf32>
    %65 = arith.addf %60, %64 : vector<32x256xf32>
    %c6 = arith.constant 6 : index
    %c0_29 = arith.constant 0 : index
    %c0_30 = arith.constant 0 : index
    %66 = vector.load %arg2[%c6, %c0_29, %c0_30] : memref<9x8x32xbf16, #tpu.memory_space<vmem>>, vector<1x8x32xbf16>
    %67 = vector.shape_cast %66 : vector<1x8x32xbf16> to vector<8x32xbf16>
    %68 = vector.extract_strided_slice %25 {offsets = [0, 32], sizes = [8, 256], strides = [1, 1]} : vector<8x288xbf16> to vector<8x256xbf16>
    %cst_31 = arith.constant dense<0.000000e+00> : vector<32x256xf32>
    %69 = tpu.matmul %67, %68, %cst_31 {dimension_numbers = #tpu.dot_dimension_numbers<[0], [0], [1], [1], [0, 1, 1, 1], [], []>} : vector<8x32xbf16>, vector<8x256xbf16>, vector<32x256xf32> -> vector<32x256xf32>
    %70 = arith.addf %65, %69 : vector<32x256xf32>
    %c7 = arith.constant 7 : index
    %c0_32 = arith.constant 0 : index
    %c0_33 = arith.constant 0 : index
    %71 = vector.load %arg2[%c7, %c0_32, %c0_33] : memref<9x8x32xbf16, #tpu.memory_space<vmem>>, vector<1x8x32xbf16>
    %72 = vector.shape_cast %71 : vector<1x8x32xbf16> to vector<8x32xbf16>
    %73 = vector.extract_strided_slice %26 {offsets = [0, 32], sizes = [8, 256], strides = [1, 1]} : vector<8x288xbf16> to vector<8x256xbf16>
    %cst_34 = arith.constant dense<0.000000e+00> : vector<32x256xf32>
    %74 = tpu.matmul %72, %73, %cst_34 {dimension_numbers = #tpu.dot_dimension_numbers<[0], [0], [1], [1], [0, 1, 1, 1], [], []>} : vector<8x32xbf16>, vector<8x256xbf16>, vector<32x256xf32> -> vector<32x256xf32>
    %75 = arith.addf %70, %74 : vector<32x256xf32>
    %c8 = arith.constant 8 : index
    %c0_35 = arith.constant 0 : index
    %c0_36 = arith.constant 0 : index
    %76 = vector.load %arg2[%c8, %c0_35, %c0_36] : memref<9x8x32xbf16, #tpu.memory_space<vmem>>, vector<1x8x32xbf16>
    %77 = vector.shape_cast %76 : vector<1x8x32xbf16> to vector<8x32xbf16>
    %78 = vector.extract_strided_slice %33 {offsets = [0, 32], sizes = [8, 256], strides = [1, 1]} : vector<8x288xbf16> to vector<8x256xbf16>
    %cst_37 = arith.constant dense<0.000000e+00> : vector<32x256xf32>
    %79 = tpu.matmul %77, %78, %cst_37 {dimension_numbers = #tpu.dot_dimension_numbers<[0], [0], [1], [1], [0, 1, 1, 1], [], []>} : vector<8x32xbf16>, vector<8x256xbf16>, vector<32x256xf32> -> vector<32x256xf32>
    %80 = arith.addf %75, %79 : vector<32x256xf32>
    %81 = vector.extract_strided_slice %34 {offsets = [0, 0], sizes = [32, 1], strides = [1, 1]} : vector<32x2xf32> to vector<32x1xf32>
    %82 = vector.broadcast %81 : vector<32x1xf32> to vector<32x256xf32>
    %83 = arith.mulf %80, %82 : vector<32x256xf32>
    %84 = vector.extract_strided_slice %34 {offsets = [0, 1], sizes = [32, 1], strides = [1, 1]} : vector<32x2xf32> to vector<32x1xf32>
    %85 = vector.broadcast %84 : vector<32x1xf32> to vector<32x256xf32>
    %86 = arith.addf %83, %85 : vector<32x256xf32>
    %cst_38 = arith.constant 0.000000e+00 : f32
    %87 = vector.broadcast %cst_38 : f32 to vector<32x256xf32>
    %88 = arith.maximumf %86, %87 : vector<32x256xf32>
    %89 = arith.truncf %88 : vector<32x256xf32> to vector<32x256xbf16>
    %c0_39 = arith.constant 0 : index
    %c0_40 = arith.constant 0 : index
    %c0_41 = arith.constant 0 : index
    %90 = vector.load %arg12[%c0_39, %c0_40, %c0_41] : memref<1x32x256xbf16, #tpu.memory_space<vmem>>, vector<1x32x256xbf16>
    %91 = vector.shape_cast %90 : vector<1x32x256xbf16> to vector<32x256xbf16>
    %92 = vector.shape_cast %89 : vector<32x256xbf16> to vector<1x32x256xbf16>
    tpu.vector_store %arg12[%c0_39, %c0_40, %c0_41], %92 {strides = array<i32>} : memref<1x32x256xbf16, #tpu.memory_space<vmem>>, vector<1x32x256xbf16>,
    %93 = vector.extract_strided_slice %26 {offsets = [0, 16], sizes = [8, 256], strides = [1, 1]} : vector<8x288xbf16> to vector<8x256xbf16>
    %c0_42 = arith.constant 0 : index
    %c0_43 = arith.constant 0 : index
    %94 = vector.load %arg5[%c0_42, %c0_43] : memref<8x2xf32, #tpu.memory_space<vmem>>, vector<8x2xf32>
    %c0_44 = arith.constant 0 : index
    %c0_45 = arith.constant 0 : index
    %95 = vector.load %arg4[%c0_44, %c0_45] : memref<8x8xbf16, #tpu.memory_space<vmem>>, vector<8x8xbf16>
    %cst_46 = arith.constant dense<0.000000e+00> : vector<8x256xf32>
    %96 = tpu.matmul %95, %93, %cst_46 {dimension_numbers = #tpu.dot_dimension_numbers<[0], [0], [1], [1], [0, 1, 1, 1], [], []>} : vector<8x8xbf16>, vector<8x256xbf16>, vector<8x256xf32> -> vector<8x256xf32>
    %97 = vector.extract_strided_slice %94 {offsets = [0, 0], sizes = [8, 1], strides = [1, 1]} : vector<8x2xf32> to vector<8x1xf32>
    %98 = vector.broadcast %97 : vector<8x1xf32> to vector<8x256xf32>
    %99 = arith.mulf %96, %98 : vector<8x256xf32>
    %100 = vector.extract_strided_slice %94 {offsets = [0, 1], sizes = [8, 1], strides = [1, 1]} : vector<8x2xf32> to vector<8x1xf32>
    %101 = vector.broadcast %100 : vector<8x1xf32> to vector<8x256xf32>
    %102 = arith.addf %99, %101 : vector<8x256xf32>
    %cst_47 = arith.constant 0.000000e+00 : f32
    %103 = vector.broadcast %cst_47 : f32 to vector<8x256xf32>
    %104 = arith.maximumf %102, %103 : vector<8x256xf32>
    %c0_48 = arith.constant 0 : index
    %c0_49 = arith.constant 0 : index
    %105 = vector.load %arg6[%c0_48, %c0_49] : memref<8x8xbf16, #tpu.memory_space<vmem>>, vector<8x8xbf16>
    %106 = arith.truncf %104 : vector<8x256xf32> to vector<8x256xbf16>
    %cst_50 = arith.constant dense<0.000000e+00> : vector<8x256xf32>
    %107 = tpu.matmul %105, %106, %cst_50 {dimension_numbers = #tpu.dot_dimension_numbers<[0], [0], [1], [1], [0, 1, 1, 1], [], []>} : vector<8x8xbf16>, vector<8x256xbf16>, vector<8x256xf32> -> vector<8x256xf32>
    %c0_51 = arith.constant 0 : index
    %c0_52 = arith.constant 0 : index
    %108 = vector.load %arg7[%c0_51, %c0_52] : memref<8x1xf32, #tpu.memory_space<vmem>>, vector<8x1xf32>
    %109 = vector.broadcast %108 : vector<8x1xf32> to vector<8x256xf32>
    %110 = arith.addf %107, %109 : vector<8x256xf32>
    %c0_53 = arith.constant 0 : index
    %c0_54 = arith.constant 0 : index
    %c0_55 = arith.constant 0 : index
    %111 = vector.load %arg13[%c0_53, %c0_54, %c0_55] : memref<1x8x256xf32, #tpu.memory_space<vmem>>, vector<1x8x256xf32>
    %112 = vector.shape_cast %111 : vector<1x8x256xf32> to vector<8x256xf32>
    %113 = vector.shape_cast %110 : vector<8x256xf32> to vector<1x8x256xf32>
    tpu.vector_store %arg13[%c0_53, %c0_54, %c0_55], %113 {strides = array<i32>} : memref<1x8x256xf32, #tpu.memory_space<vmem>>, vector<1x8x256xf32>,
    %cst_56 = arith.constant dense<0xFF800000> : vector<8xf32>
    %114 = vector.multi_reduction <maximumf>, %110, %cst_56 [1] : vector<8x256xf32> to vector<8xf32>
    %115 = vector.shape_cast %114 : vector<8xf32> to vector<8x1xf32>
    %116 = vector.broadcast %115 : vector<8x1xf32> to vector<8x256xf32>
    %117 = arith.subf %110, %116 : vector<8x256xf32>
    %118 = math.exp %117 : vector<8x256xf32>
    %cst_57 = arith.constant dense<0.000000e+00> : vector<8xf32>
    %119 = vector.multi_reduction <add>, %118, %cst_57 [1] : vector<8x256xf32> to vector<8xf32>
    %120 = vector.shape_cast %119 : vector<8xf32> to vector<8x1xf32>
    %121 = arith.truncf %118 : vector<8x256xf32> to vector<8x256xbf16>
    %cst_58 = arith.constant dense<0.000000e+00> : vector<8x32xf32>
    %122 = tpu.matmul %121, %89, %cst_58 {dimension_numbers = #tpu.dot_dimension_numbers<[1], [1], [0], [0], [0, 0, 1, 0], [], []>} : vector<8x256xbf16>, vector<32x256xbf16>, vector<8x32xf32> -> vector<8x32xf32>
    %123 = vector.broadcast %120 : vector<8x1xf32> to vector<8x32xf32>
    %124 = arith.divf %122, %123 : vector<8x32xf32>
    %125 = arith.truncf %124 : vector<8x32xf32> to vector<8x32xbf16>
    %c0_59 = arith.constant 0 : index
    %c0_60 = arith.constant 0 : index
    %126 = vector.load %arg9[%c0_59, %c0_60] : memref<2x32xf32, #tpu.memory_space<vmem>>, vector<2x32xf32>
    %c0_61 = arith.constant 0 : index
    %c0_62 = arith.constant 0 : index
    %127 = vector.load %arg8[%c0_61, %c0_62] : memref<32x32xbf16, #tpu.memory_space<vmem>>, vector<32x32xbf16>
    %cst_63 = arith.constant dense<0.000000e+00> : vector<8x32xf32>
    %128 = tpu.matmul %125, %127, %cst_63 {dimension_numbers = #tpu.dot_dimension_numbers<[1], [0], [0], [1], [0, 0, 1, 1], [], []>} : vector<8x32xbf16>, vector<32x32xbf16>, vector<8x32xf32> -> vector<8x32xf32>
    %129 = vector.extract_strided_slice %126 {offsets = [0, 0], sizes = [1, 32], strides = [1, 1]} : vector<2x32xf32> to vector<1x32xf32>
    %130 = vector.broadcast %129 : vector<1x32xf32> to vector<8x32xf32>
    %131 = arith.mulf %128, %130 : vector<8x32xf32>
    %132 = vector.extract_strided_slice %126 {offsets = [1, 0], sizes = [1, 32], strides = [1, 1]} : vector<2x32xf32> to vector<1x32xf32>
    %133 = vector.broadcast %132 : vector<1x32xf32> to vector<8x32xf32>
    %134 = arith.addf %131, %133 : vector<8x32xf32>
    %cst_64 = arith.constant 0.000000e+00 : f32
    %135 = vector.broadcast %cst_64 : f32 to vector<8x32xf32>
    %136 = arith.maximumf %134, %135 : vector<8x32xf32>
    %c0_65 = arith.constant 0 : index
    %c0_66 = arith.constant 0 : index
    %137 = vector.load %arg11[%c0_65, %c0_66] : memref<2x16xf32, #tpu.memory_space<vmem>>, vector<2x16xf32>
    %138 = vector.extract_strided_slice %136 {offsets = [0, 0], sizes = [8, 16], strides = [1, 1]} : vector<8x32xf32> to vector<8x16xf32>
    %139 = arith.truncf %138 : vector<8x16xf32> to vector<8x16xbf16>
    %c0_67 = arith.constant 0 : index
    %c0_68 = arith.constant 0 : index
    %140 = vector.load %arg10[%c0_67, %c0_68] : memref<16x16xbf16, #tpu.memory_space<vmem>>, vector<16x16xbf16>
    %cst_69 = arith.constant dense<0.000000e+00> : vector<8x16xf32>
    %141 = tpu.matmul %139, %140, %cst_69 {dimension_numbers = #tpu.dot_dimension_numbers<[1], [0], [0], [1], [0, 0, 1, 1], [], []>} : vector<8x16xbf16>, vector<16x16xbf16>, vector<8x16xf32> -> vector<8x16xf32>
    %142 = vector.extract_strided_slice %137 {offsets = [0, 0], sizes = [1, 16], strides = [1, 1]} : vector<2x16xf32> to vector<1x16xf32>
    %143 = vector.broadcast %142 : vector<1x16xf32> to vector<8x16xf32>
    %144 = arith.mulf %141, %143 : vector<8x16xf32>
    %145 = vector.extract_strided_slice %137 {offsets = [1, 0], sizes = [1, 16], strides = [1, 1]} : vector<2x16xf32> to vector<1x16xf32>
    %146 = vector.broadcast %145 : vector<1x16xf32> to vector<8x16xf32>
    %147 = arith.addf %144, %146 : vector<8x16xf32>
    %cst_70 = arith.constant 0.000000e+00 : f32
    %148 = vector.broadcast %cst_70 : f32 to vector<8x16xf32>
    %149 = arith.maximumf %147, %148 : vector<8x16xf32>
    %150 = arith.truncf %149 : vector<8x16xf32> to vector<8x16xbf16>
    %c0_71 = arith.constant 0 : index
    %c0_72 = arith.constant 0 : index
    %c0_73 = arith.constant 0 : index
    %151 = vector.load %arg14[%c0_71, %c0_72, %c0_73] : memref<1x8x16xbf16, #tpu.memory_space<vmem>>, vector<1x8x16xbf16>
    %152 = vector.shape_cast %151 : vector<1x8x16xbf16> to vector<8x16xbf16>
    %153 = vector.shape_cast %150 : vector<8x16xbf16> to vector<1x8x16xbf16>
    tpu.vector_store %arg14[%c0_71, %c0_72, %c0_73], %153 {strides = array<i32>} : memref<1x8x16xbf16, #tpu.memory_space<vmem>>, vector<1x8x16xbf16>,
    %154 = vector.extract_strided_slice %136 {offsets = [0, 16], sizes = [8, 16], strides = [1, 1]} : vector<8x32xf32> to vector<8x16xf32>
    %155 = arith.truncf %154 : vector<8x16xf32> to vector<8x16xbf16>
    %c0_74 = arith.constant 0 : index
    %c0_75 = arith.constant 0 : index
    %c0_76 = arith.constant 0 : index
    %156 = vector.load %arg15[%c0_74, %c0_75, %c0_76] : memref<1x8x16xbf16, #tpu.memory_space<vmem>>, vector<1x8x16xbf16>
    %157 = vector.shape_cast %156 : vector<1x8x16xbf16> to vector<8x16xbf16>
    %158 = vector.shape_cast %155 : vector<8x16xbf16> to vector<1x8x16xbf16>
    tpu.vector_store %arg15[%c0_74, %c0_75, %c0_76], %158 {strides = array<i32>} : memref<1x8x16xbf16, #tpu.memory_space<vmem>>, vector<1x8x16xbf16>,
    return
  }
  func.func @transform_0(%arg0: i32) -> (i32, i32, i32) {
    %c0_i32 = arith.constant 0 : i32
    %c0_i32_0 = arith.constant 0 : i32
    %c0_i32_1 = arith.constant 0 : i32
    return %arg0, %c0_i32, %c0_i32_0 : i32, i32, i32
  }
  func.func @transform_1(%arg0: i32) -> (i32, i32, i32) {
    %c0_i32 = arith.constant 0 : i32
    %c0_i32_0 = arith.constant 0 : i32
    %c0_i32_1 = arith.constant 0 : i32
    %c0_i32_2 = arith.constant 0 : i32
    return %c0_i32, %c0_i32_0, %c0_i32_1 : i32, i32, i32
  }
  func.func @transform_2(%arg0: i32) -> (i32, i32) {
    %c0_i32 = arith.constant 0 : i32
    %c0_i32_0 = arith.constant 0 : i32
    %c0_i32_1 = arith.constant 0 : i32
    return %c0_i32, %c0_i32_0 : i32, i32
  }
  func.func @transform_3(%arg0: i32) -> (i32, i32) {
    %c0_i32 = arith.constant 0 : i32
    %c0_i32_0 = arith.constant 0 : i32
    %c0_i32_1 = arith.constant 0 : i32
    return %c0_i32, %c0_i32_0 : i32, i32
  }
  func.func @transform_4(%arg0: i32) -> (i32, i32) {
    %c0_i32 = arith.constant 0 : i32
    %c0_i32_0 = arith.constant 0 : i32
    %c0_i32_1 = arith.constant 0 : i32
    return %c0_i32, %c0_i32_0 : i32, i32
  }
  func.func @transform_5(%arg0: i32) -> (i32, i32) {
    %c0_i32 = arith.constant 0 : i32
    %c0_i32_0 = arith.constant 0 : i32
    %c0_i32_1 = arith.constant 0 : i32
    return %c0_i32, %c0_i32_0 : i32, i32
  }
  func.func @transform_6(%arg0: i32) -> (i32, i32) {
    %c0_i32 = arith.constant 0 : i32
    %c0_i32_0 = arith.constant 0 : i32
    %c0_i32_1 = arith.constant 0 : i32
    return %c0_i32, %c0_i32_0 : i32, i32
  }
  func.func @transform_7(%arg0: i32) -> (i32, i32) {
    %c0_i32 = arith.constant 0 : i32
    %c0_i32_0 = arith.constant 0 : i32
    %c0_i32_1 = arith.constant 0 : i32
    return %c0_i32, %c0_i32_0 : i32, i32
  }
  func.func @transform_8(%arg0: i32) -> (i32, i32) {
    %c0_i32 = arith.constant 0 : i32
    %c0_i32_0 = arith.constant 0 : i32
    %c0_i32_1 = arith.constant 0 : i32
    return %c0_i32, %c0_i32_0 : i32, i32
  }
  func.func @transform_9(%arg0: i32) -> (i32, i32) {
    %c0_i32 = arith.constant 0 : i32
    %c0_i32_0 = arith.constant 0 : i32
    %c0_i32_1 = arith.constant 0 : i32
    return %c0_i32, %c0_i32_0 : i32, i32
  }
  func.func @transform_10(%arg0: i32) -> (i32, i32) {
    %c0_i32 = arith.constant 0 : i32
    %c0_i32_0 = arith.constant 0 : i32
    %c0_i32_1 = arith.constant 0 : i32
    return %c0_i32, %c0_i32_0 : i32, i32
  }
  func.func @transform_11(%arg0: i32) -> (i32, i32, i32) {
    %c0_i32 = arith.constant 0 : i32
    %c0_i32_0 = arith.constant 0 : i32
    %c0_i32_1 = arith.constant 0 : i32
    return %arg0, %c0_i32, %c0_i32_0 : i32, i32, i32
  }
  func.func @transform_12(%arg0: i32) -> (i32, i32, i32) {
    %c0_i32 = arith.constant 0 : i32
    %c0_i32_0 = arith.constant 0 : i32
    %c0_i32_1 = arith.constant 0 : i32
    return %arg0, %c0_i32, %c0_i32_0 : i32, i32, i32
  }
  func.func @transform_13(%arg0: i32) -> (i32, i32, i32) {
    %c0_i32 = arith.constant 0 : i32
    %c0_i32_0 = arith.constant 0 : i32
    %c0_i32_1 = arith.constant 0 : i32
    return %arg0, %c0_i32, %c0_i32_0 : i32, i32, i32
  }
  func.func @transform_14(%arg0: i32) -> (i32, i32, i32) {
    %c0_i32 = arith.constant 0 : i32
    %c0_i32_0 = arith.constant 0 : i32
    %c0_i32_1 = arith.constant 0 : i32
    return %arg0, %c0_i32, %c0_i32_0 : i32, i32, i32
  }
}

module attributes {stable_mosaic.version = 11 : i64} {
  func.func @_distri_cls_kernel(%arg0: i32, %arg1: i32, %arg2: memref<1x32x256xbf16, #tpu.memory_space<vmem>>, %arg3: memref<1x8x16xbf16, #tpu.memory_space<vmem>>, %arg4: memref<1x8x16xbf16, #tpu.memory_space<vmem>>, %arg5: memref<32x16xbf16, #tpu.memory_space<vmem>>, %arg6: memref<16x2xf32, #tpu.memory_space<vmem>>, %arg7: memref<16x16xbf16, #tpu.memory_space<vmem>>, %arg8: memref<16x2xf32, #tpu.memory_space<vmem>>, %arg9: memref<16x32xbf16, #tpu.memory_space<vmem>>, %arg10: memref<32x2xf32, #tpu.memory_space<vmem>>, %arg11: memref<64x32xbf16, #tpu.memory_space<vmem>>, %arg12: memref<32x2xf32, #tpu.memory_space<vmem>>, %arg13: memref<32x8xbf16, #tpu.memory_space<vmem>>, %arg14: memref<8x1xf32, #tpu.memory_space<vmem>>, %arg15: memref<1x32x256xf32, #tpu.memory_space<vmem>>, %arg16: memref<1x8x256xf32, #tpu.memory_space<vmem>>) attributes {dimension_semantics = [#tpu.dimension_semantics<parallel>, #tpu.dimension_semantics<parallel>], iteration_bounds = array<i64: 2, 1>, scalar_prefetch = 0 : i64, scratch_operands = 0 : i64, tpu.core_type = #tpu.core_type<tc>, window_params = [{transform_indices = @transform_0, window_bounds = array<i64: 1, 32, 256>}, {transform_indices = @transform_1, window_bounds = array<i64: 1, 8, 16>}, {transform_indices = @transform_2, window_bounds = array<i64: 1, 8, 16>}, {pipeline_mode = #tpu.pipeline_mode<synchronous>, transform_indices = @transform_3, window_bounds = array<i64: 32, 16>}, {pipeline_mode = #tpu.pipeline_mode<synchronous>, transform_indices = @transform_4, window_bounds = array<i64: 16, 2>}, {pipeline_mode = #tpu.pipeline_mode<synchronous>, transform_indices = @transform_5, window_bounds = array<i64: 16, 16>}, {pipeline_mode = #tpu.pipeline_mode<synchronous>, transform_indices = @transform_6, window_bounds = array<i64: 16, 2>}, {pipeline_mode = #tpu.pipeline_mode<synchronous>, transform_indices = @transform_7, window_bounds = array<i64: 16, 32>}, {pipeline_mode = #tpu.pipeline_mode<synchronous>, transform_indices = @transform_8, window_bounds = array<i64: 32, 2>}, {pipeline_mode = #tpu.pipeline_mode<synchronous>, transform_indices = @transform_9, window_bounds = array<i64: 64, 32>}, {pipeline_mode = #tpu.pipeline_mode<synchronous>, transform_indices = @transform_10, window_bounds = array<i64: 32, 2>}, {pipeline_mode = #tpu.pipeline_mode<synchronous>, transform_indices = @transform_11, window_bounds = array<i64: 32, 8>}, {pipeline_mode = #tpu.pipeline_mode<synchronous>, transform_indices = @transform_12, window_bounds = array<i64: 8, 1>}, {transform_indices = @transform_13, window_bounds = array<i64: 1, 32, 256>}, {transform_indices = @transform_14, window_bounds = array<i64: 1, 8, 256>}]} {
    %c0 = arith.constant 0 : index
    %c0_0 = arith.constant 0 : index
    %c0_1 = arith.constant 0 : index
    %0 = vector.load %arg2[%c0, %c0_0, %c0_1] : memref<1x32x256xbf16, #tpu.memory_space<vmem>>, vector<1x32x256xbf16>
    %1 = vector.shape_cast %0 : vector<1x32x256xbf16> to vector<32x256xbf16>
    %c0_2 = arith.constant 0 : index
    %c0_3 = arith.constant 0 : index
    %2 = vector.load %arg6[%c0_2, %c0_3] : memref<16x2xf32, #tpu.memory_space<vmem>>, vector<16x2xf32>
    %c0_4 = arith.constant 0 : index
    %c0_5 = arith.constant 0 : index
    %3 = vector.load %arg5[%c0_4, %c0_5] : memref<32x16xbf16, #tpu.memory_space<vmem>>, vector<32x16xbf16>
    %cst = arith.constant dense<0.000000e+00> : vector<16x256xf32>
    %4 = tpu.matmul %3, %1, %cst {dimension_numbers = #tpu.dot_dimension_numbers<[0], [0], [1], [1], [0, 1, 1, 1], [], []>} : vector<32x16xbf16>, vector<32x256xbf16>, vector<16x256xf32> -> vector<16x256xf32>
    %5 = vector.extract_strided_slice %2 {offsets = [0, 0], sizes = [16, 1], strides = [1, 1]} : vector<16x2xf32> to vector<16x1xf32>
    %6 = vector.broadcast %5 : vector<16x1xf32> to vector<16x256xf32>
    %7 = arith.mulf %4, %6 : vector<16x256xf32>
    %8 = vector.extract_strided_slice %2 {offsets = [0, 1], sizes = [16, 1], strides = [1, 1]} : vector<16x2xf32> to vector<16x1xf32>
    %9 = vector.broadcast %8 : vector<16x1xf32> to vector<16x256xf32>
    %10 = arith.addf %7, %9 : vector<16x256xf32>
    %cst_6 = arith.constant 0.000000e+00 : f32
    %11 = vector.broadcast %cst_6 : f32 to vector<16x256xf32>
    %12 = arith.maximumf %10, %11 : vector<16x256xf32>
    %c0_7 = arith.constant 0 : index
    %c0_8 = arith.constant 0 : index
    %13 = vector.load %arg8[%c0_7, %c0_8] : memref<16x2xf32, #tpu.memory_space<vmem>>, vector<16x2xf32>
    %c0_9 = arith.constant 0 : index
    %c0_10 = arith.constant 0 : index
    %14 = vector.load %arg7[%c0_9, %c0_10] : memref<16x16xbf16, #tpu.memory_space<vmem>>, vector<16x16xbf16>
    %15 = arith.truncf %12 : vector<16x256xf32> to vector<16x256xbf16>
    %cst_11 = arith.constant dense<0.000000e+00> : vector<16x256xf32>
    %16 = tpu.matmul %14, %15, %cst_11 {dimension_numbers = #tpu.dot_dimension_numbers<[0], [0], [1], [1], [0, 1, 1, 1], [], []>} : vector<16x16xbf16>, vector<16x256xbf16>, vector<16x256xf32> -> vector<16x256xf32>
    %17 = vector.extract_strided_slice %13 {offsets = [0, 0], sizes = [16, 1], strides = [1, 1]} : vector<16x2xf32> to vector<16x1xf32>
    %18 = vector.broadcast %17 : vector<16x1xf32> to vector<16x256xf32>
    %19 = arith.mulf %16, %18 : vector<16x256xf32>
    %20 = vector.extract_strided_slice %13 {offsets = [0, 1], sizes = [16, 1], strides = [1, 1]} : vector<16x2xf32> to vector<16x1xf32>
    %21 = vector.broadcast %20 : vector<16x1xf32> to vector<16x256xf32>
    %22 = arith.addf %19, %21 : vector<16x256xf32>
    %cst_12 = arith.constant 0.000000e+00 : f32
    %23 = vector.broadcast %cst_12 : f32 to vector<16x256xf32>
    %24 = arith.maximumf %22, %23 : vector<16x256xf32>
    %c0_13 = arith.constant 0 : index
    %c0_14 = arith.constant 0 : index
    %c0_15 = arith.constant 0 : index
    %25 = vector.load %arg3[%c0_13, %c0_14, %c0_15] : memref<1x8x16xbf16, #tpu.memory_space<vmem>>, vector<1x8x16xbf16>
    %26 = vector.shape_cast %25 : vector<1x8x16xbf16> to vector<8x16xbf16>
    %27 = arith.truncf %24 : vector<16x256xf32> to vector<16x256xbf16>
    %cst_16 = arith.constant dense<0.000000e+00> : vector<8x256xf32>
    %28 = tpu.matmul %26, %27, %cst_16 {dimension_numbers = #tpu.dot_dimension_numbers<[1], [0], [0], [1], [0, 0, 1, 1], [], []>} : vector<8x16xbf16>, vector<16x256xbf16>, vector<8x256xf32> -> vector<8x256xf32>
    %cst_17 = arith.constant dense<0xFF800000> : vector<256xf32>
    %29 = vector.multi_reduction <maximumf>, %28, %cst_17 [0] : vector<8x256xf32> to vector<256xf32>
    %30 = vector.shape_cast %29 : vector<256xf32> to vector<1x256xf32>
    %31 = vector.broadcast %30 : vector<1x256xf32> to vector<8x256xf32>
    %32 = arith.subf %28, %31 : vector<8x256xf32>
    %33 = math.exp %32 : vector<8x256xf32>
    %cst_18 = arith.constant dense<0.000000e+00> : vector<256xf32>
    %34 = vector.multi_reduction <add>, %33, %cst_18 [0] : vector<8x256xf32> to vector<256xf32>
    %35 = vector.shape_cast %34 : vector<256xf32> to vector<1x256xf32>
    %36 = tpu.reciprocal %35 {approx = true} : vector<1x256xf32> -> vector<1x256xf32>
    %37 = vector.broadcast %36 : vector<1x256xf32> to vector<8x256xf32>
    %38 = arith.mulf %33, %37 : vector<8x256xf32>
    %c0_19 = arith.constant 0 : index
    %c0_20 = arith.constant 0 : index
    %c0_21 = arith.constant 0 : index
    %39 = vector.load %arg4[%c0_19, %c0_20, %c0_21] : memref<1x8x16xbf16, #tpu.memory_space<vmem>>, vector<1x8x16xbf16>
    %40 = vector.shape_cast %39 : vector<1x8x16xbf16> to vector<8x16xbf16>
    %41 = arith.truncf %38 : vector<8x256xf32> to vector<8x256xbf16>
    %cst_22 = arith.constant dense<0.000000e+00> : vector<16x256xf32>
    %42 = tpu.matmul %40, %41, %cst_22 {dimension_numbers = #tpu.dot_dimension_numbers<[0], [0], [1], [1], [0, 1, 1, 1], [], []>} : vector<8x16xbf16>, vector<8x256xbf16>, vector<16x256xf32> -> vector<16x256xf32>
    %c0_23 = arith.constant 0 : index
    %c0_24 = arith.constant 0 : index
    %43 = vector.load %arg10[%c0_23, %c0_24] : memref<32x2xf32, #tpu.memory_space<vmem>>, vector<32x2xf32>
    %c0_25 = arith.constant 0 : index
    %c0_26 = arith.constant 0 : index
    %44 = vector.load %arg9[%c0_25, %c0_26] : memref<16x32xbf16, #tpu.memory_space<vmem>>, vector<16x32xbf16>
    %45 = arith.truncf %42 : vector<16x256xf32> to vector<16x256xbf16>
    %cst_27 = arith.constant dense<0.000000e+00> : vector<32x256xf32>
    %46 = tpu.matmul %44, %45, %cst_27 {dimension_numbers = #tpu.dot_dimension_numbers<[0], [0], [1], [1], [0, 1, 1, 1], [], []>} : vector<16x32xbf16>, vector<16x256xbf16>, vector<32x256xf32> -> vector<32x256xf32>
    %47 = vector.extract_strided_slice %43 {offsets = [0, 0], sizes = [32, 1], strides = [1, 1]} : vector<32x2xf32> to vector<32x1xf32>
    %48 = vector.broadcast %47 : vector<32x1xf32> to vector<32x256xf32>
    %49 = arith.mulf %46, %48 : vector<32x256xf32>
    %50 = vector.extract_strided_slice %43 {offsets = [0, 1], sizes = [32, 1], strides = [1, 1]} : vector<32x2xf32> to vector<32x1xf32>
    %51 = vector.broadcast %50 : vector<32x1xf32> to vector<32x256xf32>
    %52 = arith.addf %49, %51 : vector<32x256xf32>
    %cst_28 = arith.constant 0.000000e+00 : f32
    %53 = vector.broadcast %cst_28 : f32 to vector<32x256xf32>
    %54 = arith.maximumf %52, %53 : vector<32x256xf32>
    %c0_29 = arith.constant 0 : index
    %c0_30 = arith.constant 0 : index
    %55 = vector.load %arg11[%c0_29, %c0_30] : memref<64x32xbf16, #tpu.memory_space<vmem>>, vector<64x32xbf16>
    %56 = vector.extract_strided_slice %55 {offsets = [0, 0], sizes = [32, 32], strides = [1, 1]} : vector<64x32xbf16> to vector<32x32xbf16>
    %57 = arith.truncf %54 : vector<32x256xf32> to vector<32x256xbf16>
    %cst_31 = arith.constant dense<0.000000e+00> : vector<32x256xf32>
    %58 = tpu.matmul %56, %57, %cst_31 {dimension_numbers = #tpu.dot_dimension_numbers<[0], [0], [1], [1], [0, 1, 1, 1], [], []>} : vector<32x32xbf16>, vector<32x256xbf16>, vector<32x256xf32> -> vector<32x256xf32>
    %59 = vector.extract_strided_slice %55 {offsets = [32, 0], sizes = [32, 32], strides = [1, 1]} : vector<64x32xbf16> to vector<32x32xbf16>
    %cst_32 = arith.constant dense<0.000000e+00> : vector<32x256xf32>
    %60 = tpu.matmul %59, %1, %cst_32 {dimension_numbers = #tpu.dot_dimension_numbers<[0], [0], [1], [1], [0, 1, 1, 1], [], []>} : vector<32x32xbf16>, vector<32x256xbf16>, vector<32x256xf32> -> vector<32x256xf32>
    %61 = arith.addf %58, %60 : vector<32x256xf32>
    %c0_33 = arith.constant 0 : index
    %c0_34 = arith.constant 0 : index
    %62 = vector.load %arg12[%c0_33, %c0_34] : memref<32x2xf32, #tpu.memory_space<vmem>>, vector<32x2xf32>
    %63 = vector.extract_strided_slice %62 {offsets = [0, 0], sizes = [32, 1], strides = [1, 1]} : vector<32x2xf32> to vector<32x1xf32>
    %64 = vector.broadcast %63 : vector<32x1xf32> to vector<32x256xf32>
    %65 = arith.mulf %61, %64 : vector<32x256xf32>
    %66 = vector.extract_strided_slice %62 {offsets = [0, 1], sizes = [32, 1], strides = [1, 1]} : vector<32x2xf32> to vector<32x1xf32>
    %67 = vector.broadcast %66 : vector<32x1xf32> to vector<32x256xf32>
    %68 = arith.addf %65, %67 : vector<32x256xf32>
    %cst_35 = arith.constant 0.000000e+00 : f32
    %69 = vector.broadcast %cst_35 : f32 to vector<32x256xf32>
    %70 = arith.maximumf %68, %69 : vector<32x256xf32>
    %c0_36 = arith.constant 0 : index
    %c0_37 = arith.constant 0 : index
    %c0_38 = arith.constant 0 : index
    %71 = vector.load %arg15[%c0_36, %c0_37, %c0_38] : memref<1x32x256xf32, #tpu.memory_space<vmem>>, vector<1x32x256xf32>
    %72 = vector.shape_cast %71 : vector<1x32x256xf32> to vector<32x256xf32>
    %73 = vector.shape_cast %70 : vector<32x256xf32> to vector<1x32x256xf32>
    tpu.vector_store %arg15[%c0_36, %c0_37, %c0_38], %73 {strides = array<i32>} : memref<1x32x256xf32, #tpu.memory_space<vmem>>, vector<1x32x256xf32>,
    %c0_39 = arith.constant 0 : index
    %c0_40 = arith.constant 0 : index
    %74 = vector.load %arg13[%c0_39, %c0_40] : memref<32x8xbf16, #tpu.memory_space<vmem>>, vector<32x8xbf16>
    %75 = arith.truncf %70 : vector<32x256xf32> to vector<32x256xbf16>
    %cst_41 = arith.constant dense<0.000000e+00> : vector<8x256xf32>
    %76 = tpu.matmul %74, %75, %cst_41 {dimension_numbers = #tpu.dot_dimension_numbers<[0], [0], [1], [1], [0, 1, 1, 1], [], []>} : vector<32x8xbf16>, vector<32x256xbf16>, vector<8x256xf32> -> vector<8x256xf32>
    %c0_42 = arith.constant 0 : index
    %c0_43 = arith.constant 0 : index
    %77 = vector.load %arg14[%c0_42, %c0_43] : memref<8x1xf32, #tpu.memory_space<vmem>>, vector<8x1xf32>
    %78 = vector.broadcast %77 : vector<8x1xf32> to vector<8x256xf32>
    %79 = arith.addf %76, %78 : vector<8x256xf32>
    %c0_44 = arith.constant 0 : index
    %c0_45 = arith.constant 0 : index
    %c0_46 = arith.constant 0 : index
    %80 = vector.load %arg16[%c0_44, %c0_45, %c0_46] : memref<1x8x256xf32, #tpu.memory_space<vmem>>, vector<1x8x256xf32>
    %81 = vector.shape_cast %80 : vector<1x8x256xf32> to vector<8x256xf32>
    %82 = vector.shape_cast %79 : vector<8x256xf32> to vector<1x8x256xf32>
    tpu.vector_store %arg16[%c0_44, %c0_45, %c0_46], %82 {strides = array<i32>} : memref<1x8x256xf32, #tpu.memory_space<vmem>>, vector<1x8x256xf32>,
    return
  }
  func.func @transform_0(%arg0: i32, %arg1: i32) -> (i32, i32, i32) {
    %c0_i32 = arith.constant 0 : i32
    %c0_i32_0 = arith.constant 0 : i32
    return %arg0, %c0_i32, %arg1 : i32, i32, i32
  }
  func.func @transform_1(%arg0: i32, %arg1: i32) -> (i32, i32, i32) {
    %c0_i32 = arith.constant 0 : i32
    %c0_i32_0 = arith.constant 0 : i32
    %c0_i32_1 = arith.constant 0 : i32
    return %arg0, %c0_i32, %c0_i32_0 : i32, i32, i32
  }
  func.func @transform_2(%arg0: i32, %arg1: i32) -> (i32, i32, i32) {
    %c0_i32 = arith.constant 0 : i32
    %c0_i32_0 = arith.constant 0 : i32
    %c0_i32_1 = arith.constant 0 : i32
    return %arg0, %c0_i32, %c0_i32_0 : i32, i32, i32
  }
  func.func @transform_3(%arg0: i32, %arg1: i32) -> (i32, i32) {
    %c0_i32 = arith.constant 0 : i32
    %c0_i32_0 = arith.constant 0 : i32
    %c0_i32_1 = arith.constant 0 : i32
    return %c0_i32, %c0_i32_0 : i32, i32
  }
  func.func @transform_4(%arg0: i32, %arg1: i32) -> (i32, i32) {
    %c0_i32 = arith.constant 0 : i32
    %c0_i32_0 = arith.constant 0 : i32
    %c0_i32_1 = arith.constant 0 : i32
    return %c0_i32, %c0_i32_0 : i32, i32
  }
  func.func @transform_5(%arg0: i32, %arg1: i32) -> (i32, i32) {
    %c0_i32 = arith.constant 0 : i32
    %c0_i32_0 = arith.constant 0 : i32
    %c0_i32_1 = arith.constant 0 : i32
    return %c0_i32, %c0_i32_0 : i32, i32
  }
  func.func @transform_6(%arg0: i32, %arg1: i32) -> (i32, i32) {
    %c0_i32 = arith.constant 0 : i32
    %c0_i32_0 = arith.constant 0 : i32
    %c0_i32_1 = arith.constant 0 : i32
    return %c0_i32, %c0_i32_0 : i32, i32
  }
  func.func @transform_7(%arg0: i32, %arg1: i32) -> (i32, i32) {
    %c0_i32 = arith.constant 0 : i32
    %c0_i32_0 = arith.constant 0 : i32
    %c0_i32_1 = arith.constant 0 : i32
    return %c0_i32, %c0_i32_0 : i32, i32
  }
  func.func @transform_8(%arg0: i32, %arg1: i32) -> (i32, i32) {
    %c0_i32 = arith.constant 0 : i32
    %c0_i32_0 = arith.constant 0 : i32
    %c0_i32_1 = arith.constant 0 : i32
    return %c0_i32, %c0_i32_0 : i32, i32
  }
  func.func @transform_9(%arg0: i32, %arg1: i32) -> (i32, i32) {
    %c0_i32 = arith.constant 0 : i32
    %c0_i32_0 = arith.constant 0 : i32
    %c0_i32_1 = arith.constant 0 : i32
    return %c0_i32, %c0_i32_0 : i32, i32
  }
  func.func @transform_10(%arg0: i32, %arg1: i32) -> (i32, i32) {
    %c0_i32 = arith.constant 0 : i32
    %c0_i32_0 = arith.constant 0 : i32
    %c0_i32_1 = arith.constant 0 : i32
    return %c0_i32, %c0_i32_0 : i32, i32
  }
  func.func @transform_11(%arg0: i32, %arg1: i32) -> (i32, i32) {
    %c0_i32 = arith.constant 0 : i32
    %c0_i32_0 = arith.constant 0 : i32
    %c0_i32_1 = arith.constant 0 : i32
    return %c0_i32, %c0_i32_0 : i32, i32
  }
  func.func @transform_12(%arg0: i32, %arg1: i32) -> (i32, i32) {
    %c0_i32 = arith.constant 0 : i32
    %c0_i32_0 = arith.constant 0 : i32
    %c0_i32_1 = arith.constant 0 : i32
    return %c0_i32, %c0_i32_0 : i32, i32
  }
  func.func @transform_13(%arg0: i32, %arg1: i32) -> (i32, i32, i32) {
    %c0_i32 = arith.constant 0 : i32
    %c0_i32_0 = arith.constant 0 : i32
    return %arg0, %c0_i32, %arg1 : i32, i32, i32
  }
  func.func @transform_14(%arg0: i32, %arg1: i32) -> (i32, i32, i32) {
    %c0_i32 = arith.constant 0 : i32
    %c0_i32_0 = arith.constant 0 : i32
    return %arg0, %c0_i32, %arg1 : i32, i32, i32
  }
}

</mosaic_0001>

<bundles_post_ra>
// kernel: ocr_block_forward.3
= control target key start
LH: loop header
LB: loop body
LE: loop exit
PB: predicated region body
PF: predicated region fallthrough
CT: control target
= control target key end

     0   :  { %s1762_s29 = smov 0   ;;  %s1764_s30 = smov 0   ;;  %s1956_s0 = inlined_call_operand.vmem [shape: bf16[2,32,256], index: 0, kind: input, shape index: {}]   ;;  %s1957_s1 = inlined_call_operand.vmem [shape: bf16[2,8,16], index: 1, kind: input, shape index: {}]   ;;  %s1958_s2 = inlined_call_operand.vmem [shape: bf16[2,8,16], index: 2, kind: input, shape index: {}]   ;;  %s1959_s3 = inlined_call_operand.vmem [shape: bf16[32,16], index: 3, kind: input, shape index: {}]   ;;  %s1960_s4 = inlined_call_operand.vmem [shape: f32[16,2], index: 4, kind: input, shape index: {}]   ;;  %s1961_s5 = inlined_call_operand.vmem [shape: bf16[16,16], index: 5, kind: input, shape index: {}]   ;;  %s1962_s6 = inlined_call_operand.vmem [shape: f32[16,2], index: 6, kind: input, shape index: {}]   ;;  %s1963_s7 = inlined_call_operand.vmem [shape: bf16[16,32], index: 7, kind: input, shape index: {}]   ;;  %s1964_s8 = inlined_call_operand.vmem [shape: f32[32,2], index: 8, kind: input, shape index: {}]   ;;  %s1965_s9 = inlined_call_operand.vmem [shape: bf16[64,32], index: 9, kind: input, shape index: {}]   ;;  %s1966_s10 = inlined_call_operand.vmem [shape: f32[32,2], index: 10, kind: input, shape index: {}]   ;;  %s1967_s11 = inlined_call_operand.vmem [shape: bf16[32,8], index: 11, kind: input, shape index: {}]   ;;  %s1968_s12 = inlined_call_operand.vmem [shape: f32[8,1], index: 12, kind: input, shape index: {}]   ;;  %s1969_s13 = inlined_call_operand.vmem [shape: f32[2,32,256], index: 13, kind: output, shape index: {0}]   ;;  %s1970_s14 = inlined_call_operand.vmem [shape: f32[2,8,256], index: 14, kind: output, shape index: {1}]  }
   0x1   :  { %s1766_s15 = smov 0  }
   0x2 LB: > { %s37_s16 = sadd.s32 1, %s1679_s30  ;;  %p1500_p0 = scmp.ge.s32.totalorder %s1683_s15, 1  ;;  %s1683_s15 = sphi %s1766_s15, %s25_s15   ;;  %s1679_s30 = sphi %s1764_s30, %s1972_s30   ;;  %s1675_s29 = sphi %s1762_s29, %s1971_s29  }
   0x3   : > { %p39_p1 = scmp.ge.s32.totalorder %s37_s16, 2  ;;  %p456_p2 = scmp.lt.s32.totalorder %s1683_s15, 3 }
   0x5   : > { %s1974_s16 = smov (%p39_p1, %s37_s16), 0  ;;  %p457_p3 = pnand %p1500_p0, %p456_p2 }
   0x6   : > { %p528_p4 = scmp.lt.s32.totalorder (!%p457_p3), %s1675_s29, 1 }
   0x7   : > { %460 = sbr.rel (%p457_p3) target bundleno = 1283 (0x503), region = 72 }
   0xc   : > { %v570_v0 = vld [vmem:[%s1960_s4] sm:$0xff]  ;;  %v1685_v2 = vmov 0   ;;  %v571_v3 = vld [vmem:[%s1960_s4 + $0x8] sm:$0xff]  ;;  %s1976_s29 = smov (!%p528_p4, %s1675_s29), 1  ;;  %v1686_v19 = vmov 1   ;;  %vm624_vm0 = vcmask 261120  }
   0xd   : > { %v1596_v1 = vld [vmem:[%s1959_s3] sm:$0xff]  ;;  %1632 = vset.pattern.permute.xlu1 %v1685_v2  ;;  %v1597_v4 = vld [vmem:[%s1959_s3 + $0x8] sm:$0xff]  ;;  %s1589_s25 = sshll.u32 %s1976_s29, 5  ;;  %1633 = vset.pattern.permute.xlu2 %v1686_v19  ;;  %v1825_v21 = vld [vmem:[%s1964_s8 + $0x18] sm:$0xff]  ;;  %vm714_vm1 = vcmask 130048   ;;  %s1503_s19 = sshll.u32 %s1976_s29, 2 }
   0xe   : > { %658 = vperm.xlu1 %1632, %v570_v0   ;;  %588 = vxpose.xlu0.c.b16.start [1/2] (short) (narrow) %v1596_v1, 16  ;;  %s535_s28 = scalar_lea.vmem %s1956_s0, %s1589_s25  ;;  %v1598_v17 = vld [vmem:[%s1961_s5] sm:$0xff]  ;;  %v687_v22 = vld [vmem:[%s1962_s6 + $0x8] sm:$0xff]  ;;  %s544_s22 = scalar_lea.vmem %s1958_s2, %s1503_s19  ;;  %vm865_vm2 = vcmask 1043456   ;;  %vm861_vm3 = vcmask 64512  }
   0xf   : > { %v1527_v5 = vld [vmem:[%s535_s28 + $0x10] sm:$0xf]  ;;  %v1595_v6 = vld [vmem:[%s535_s28 + $0x14] sm:$0xf0]  ;;  %v1594_v7 = vld [vmem:[%s535_s28 + $0x14] sm:$0xf]  ;;  %671 = vperm.xlu2 %1633, %v570_v0   ;;  %s540_s25 = scalar_lea.vmem %s1957_s1, %s1503_s19 }
  0x10   : > { %v1799_v8 = vor.u32 %v1595_v6, %v1527_v5  ;;  %v1529_v9 = vld [vmem:[%s535_s28 + $0x18] sm:$0xf0]  ;;  %v1519_v10 = vld [vmem:[%s535_s28] sm:$0xf]  ;;  %v1593_v11 = vld [vmem:[%s535_s28 + $0x4] sm:$0xf0] }
  0x11   : > { %v1801_v12 = vor.u32 %v1594_v7, %v1529_v9  ;;  %v1592_v13 = vld [vmem:[%s535_s28 + $0x4] sm:$0xf]  ;;  %v1521_v14 = vld [vmem:[%s535_s28 + $0x8] sm:$0xf0]  ;;  %v1804_v15 = vor.u32 %v1593_v11, %v1519_v10  ;;  %v842_v49 = vld [vmem:[%s544_s22] sm:$0xf] }
  0x12   : > { %634 = vmatpush.bf16.msra.mxu0 %v1799_v8  ;;  %v1807_v16 = vor.u32 %v1592_v13, %v1521_v14  ;;  %v1599_v18 = vld [vmem:[%s1963_s7] sm:$0xff]  ;;  %v1844_v29 = vld [vmem:[%s1964_s8 + $0x8] sm:$0xff]  ;;  %s1590_s24 = sshll.u32 %s1976_s29, 6  ;;  %s1591_s18 = sshll.u32 %s1976_s29, 4 }
  0x13   : > { %648 = vmatpush.bf16.msra.mxu1 %v1801_v12  ;;  %v686_v23 = vld [vmem:[%s1962_s6] sm:$0xff]  ;;  %s1928_s27 = scalar_lea.vmem %s1969_s13, %s1590_s24  ;;  %s563_s21 = scalar_lea.vmem %s1970_s14, %s1591_s18 }
  0x14   : > { %v1837_v24 = vld [vmem:[%s1964_s8] sm:$0xff] }
  0x15   : > { %v776_v10 = vld [vmem:[%s540_s25] sm:$0xf] }
  0x16   : > { %663 = vperm.xlu1 %1632, %v571_v3   ;;  %635 = vmatpush.bf16.msra.mxu0 %v1804_v15 }
  0x17   : > { %649 = vmatpush.bf16.msra.mxu1 %v1807_v16  ;;  %675 = vperm.xlu2 %1633, %v571_v3  }
  0x1e   : > { %589 = vxpose.xlu0.c.b16.end [2/2] (short) (narrow) %v1597_v4, 16 }
  0x1f   : > { %1634 = vset.pattern.permute.xlu2 %v1685_v2 }
  0x20   : > { %748 = vperm.xlu2 %1634, %v686_v23  }
  0x28   : > { %1636 = vset.pattern.permute.xlu2 %v1686_v19 }
  0x29   : > { %761 = vperm.xlu2 %1636, %v686_v23  }
  0x31   : > { %765 = vperm.xlu2 %1636, %v687_v22  }
  0x4b   : > { %698 = vxpose.xlu1.c.b16.start.end [1/1] (short) (narrow) %v1598_v17, 16 }
  0x57   : > { %845 = vxpose.xlu2.c.b16.start.end [1/1] (short) (narrow) %v842_v49, 16 }
  0x5b   : > { %914 = vxpose.xlu1.c.b16.start.end [1/1] (short) (narrow) %v1599_v18, 32 }
  0x69   : > { %v672_v26 = vpop.permute.xlu2 %671 }
  0x71   : > { %v676_v39 = vpop.permute.xlu2 %675 }
  0x7a   : > { %v749_v50 = vpop.permute.xlu2 %748 }
  0x80   : > { %v659_v25 = vpop.permute.xlu1 %658 }
  0x83   : > { %v762_v51 = vpop.permute.xlu2 %761 }
  0x85   : > { %1635 = vset.pattern.permute.xlu0 %v1685_v2 }
  0x88   : > { %v664_v32 = vpop.permute.xlu1 %663 }
  0x8b   : > { %v766_v63 = vpop.permute.xlu2 %765 }
  0x8c   : > { %753 = vperm.xlu0 %1635, %v687_v22  }
  0x94   : > { %976 = vperm.xlu0 %1635, %v1837_v24  }
  0x9c   : > { %981 = vperm.xlu0 %1635, %v1844_v29  }
  0xa4   : > { %1638 = vset.pattern.permute.xlu0 %v1686_v19 }
  0xb9   : > { %1637 = vset.pattern.permute.xlu2 %v1685_v2 }
  0xba   : > { %v596_v20 = vpop.trf.xlu0 }
  0xbb   : > { %1533 = vmatmul.msk.bf16.vlgmr.msra.gmra.mxu0 %vm624_vm0, %v596_v20  ;;  %1534 = vmatmul.msk.bf16.vlgmr.msra.gmra.mxu1 %vm624_vm0, %v596_v20 }
  0xc5   : > { %991 = vperm.xlu1 %1632, %v1825_v21  }
  0xf7   : > { %v706_v48 = vpop.trf.xlu1 }
  0xfe   : > { %v754_v56 = vpop.permute.xlu0 %753 }
 0x138   : > { %v637_v27 = vpop.f32.mrf.mxu0  ;;  %v651_v28 = vpop.f32.mrf.mxu1 }
 0x139   : > { %v666_v30 = vmul.f32 %v659_v25, %v637_v27  ;;  %v667_v31 = vmul.f32 %v659_v25, %v651_v28 }
 0x13b   : > { %v678_v37 = vadd.f32 %v672_v26, %v666_v30  ;;  %v679_v38 = vadd.f32 %v672_v26, %v667_v31 }
 0x13d   : > { %v682_v42 = vmax.f32 %v678_v37, 0.0  ;;  %v683_v44 = vmax.f32 %v679_v38, 0.0 }
 0x140   : > { %v639_v33 = vpop.f32.mrf.mxu0  ;;  %v653_v34 = vpop.f32.mrf.mxu1 }
 0x141   : > { %v668_v35 = vmul.f32 %v664_v32, %v639_v33  ;;  %v669_v36 = vmul.f32 %v664_v32, %v653_v34 }
 0x143   : > { %v680_v40 = vadd.f32 %v676_v39, %v668_v35  ;;  %v681_v41 = vadd.f32 %v676_v39, %v669_v36 }
 0x145   : > { %v684_v43 = vmax.f32 %v680_v40, 0.0  ;;  %v685_v45 = vmax.f32 %v681_v41, 0.0 }
 0x147   : > { %v690_v46 = vpack.c.bf16 %v684_v43, %v682_v42  ;;  %v691_v47 = vpack.c.bf16 %v685_v45, %v683_v44 }
 0x149   : > { %725 = vmatpush.bf16.msra.mxu2 %v690_v46  ;;  %739 = vmatpush.bf16.msra.mxu3 %v691_v47 }
 0x14c   : > { %1539 = vmatmul.msk.bf16.vlgmr.msra.gmra.mxu2 %vm714_vm1, %v706_v48  ;;  %1540 = vmatmul.msk.bf16.vlgmr.msra.gmra.mxu3 %vm714_vm1, %v706_v48 }
 0x1cf   : > { %v727_v52 = vpop.f32.mrf.mxu2  ;;  %v741_v53 = vpop.f32.mrf.mxu3 }
 0x1d0   : > { %v756_v54 = vmul.f32 %v749_v50, %v727_v52  ;;  %v757_v55 = vmul.f32 %v749_v50, %v741_v53 }
 0x1d2   : > { %v768_v59 = vadd.f32 %v762_v51, %v756_v54  ;;  %v769_v60 = vadd.f32 %v762_v51, %v757_v55 }
 0x1d4   : > { %v772_v3 = vmax.f32 %v768_v59, 0.0  ;;  %v773_v4 = vmax.f32 %v769_v60, 0.0  ;;  %v853_v60 = vpop.trf.xlu2 }
 0x1d7   : > { %v729_v57 = vpop.f32.mrf.mxu2  ;;  %v743_v58 = vpop.f32.mrf.mxu3 }
 0x1d8   : > { %v758_v61 = vmul.f32 %v754_v56, %v729_v57  ;;  %v759_v62 = vmul.f32 %v754_v56, %v743_v58 }
 0x1da   : > { %v770_v0 = vadd.f32 %v766_v63, %v758_v61  ;;  %v771_v1 = vadd.f32 %v766_v63, %v759_v62  ;;  %v1600_v61 = vld [vmem:[%s1965_s9] sm:$0xff]  ;;  %v1602_v62 = vld [vmem:[%s1965_s9 + $0x10] sm:$0xff] }
 0x1db   : > { %1640 = vxpose.binary.xlu1.c.b16.start [1/4] (short) (narrow) %v1602_v62, %v1600_v61, 32 }
 0x1dc   : > { %v774_v5 = vmax.f32 %v770_v0, 0.0  ;;  %v775_v6 = vmax.f32 %v771_v1, 0.0 }
 0x1de   : > { %v777_v7 = vpack.c.bf16 %v774_v5, %v772_v3  ;;  %v778_v9 = vpack.c.bf16 %v775_v6, %v773_v4  ;;  %v922_v5 = vpop.trf.xlu1  ;;  %v1191_v6 = vld [vmem:[%s1966_s10 + $0x8] sm:$0xff] }
 0x1e0   : > { %789 = vmatpush.bf16.msrb.mxu2 %v777_v7  ;;  %802 = vmatpush.bf16.msrb.mxu3 %v778_v9  ;;  %v977_v7 = vpop.permute.xlu0 %976 }
 0x1e3   : > { %1541 = vmatmul.msk.bf16.vlgmr.msrb.gmra.mxu2 %vm714_vm1, %v776_v10  ;;  %1542 = vmatmul.msk.bf16.vlgmr.msrb.gmra.mxu3 %vm714_vm1, %v776_v10 }
 0x1e8   : > { %v982_v10 = vpop.permute.xlu0 %981 }
 0x266   : > { %v791_v11 = vpop.f32.mrf.mxu2  ;;  %v804_v13 = vpop.f32.mrf.mxu3 }
 0x267   : > { %v808_v14 = vrot.slane %v791_v11, 4  ;;  %v814_v17 = vrot.slane %v804_v13, 4 }
 0x269   : > { %v809_v18 = vmax.f32 %v791_v11, %v808_v14  ;;  %v815_v20 = vmax.f32 %v804_v13, %v814_v17 }
 0x26b   : > { %v810_v22 = vrot.slane %v809_v18, 2  ;;  %v816_v23 = vrot.slane %v815_v20, 2 }
 0x26d   : > { %v811_v25 = vmax.f32 %v809_v18, %v810_v22  ;;  %v817_v26 = vmax.f32 %v815_v20, %v816_v23  ;;  %v1190_v23 = vld [vmem:[%s1966_s10] sm:$0xff] }
 0x26e   : > { %v793_v27 = vpop.f32.mrf.mxu2  ;;  %v806_v28 = vpop.f32.mrf.mxu3 }
 0x26f   : > { %v812_v30 = vrot.slane %v811_v25, 1  ;;  %v818_v31 = vrot.slane %v817_v26, 1 }
 0x271   : > { %v813_v32 = vmax.f32 %v811_v25, %v812_v30  ;;  %v819_v33 = vmax.f32 %v817_v26, %v818_v31  ;;  %v1604_v31 = vld [vmem:[%s1967_s11] sm:$0xff] }
 0x273   : > { %v820_v34 = vsub.f32 %v791_v11, %v813_v32  ;;  %v821_v35 = vsub.f32 %v804_v13, %v819_v33 }
 0x275   : > { %v822_v36 = vmul.f32 1.442695, %v820_v34  ;;  %v824_v37 = vmul.f32 1.442695, %v821_v35 }
 0x277   : > { %1653 = vpow2.f32 %v822_v36 }
 0x278   : > { %1655 = vpow2.f32 %v824_v37 }
 0x27d   : > { %v1654_v38 = vpop.eup %1653 }
 0x27e   : > { %v1656_v39 = vpop.eup %1655  ;;  %v826_v40 = vrot.slane %v1654_v38, 4 }
 0x27f   : > { %v832_v41 = vrot.slane %v1656_v39, 4 }
 0x280   : > { %v827_v42 = vadd.f32 %v1654_v38, %v826_v40 }
 0x281   : > { %v833_v43 = vadd.f32 %v1656_v39, %v832_v41 }
 0x282   : > { %v828_v44 = vrot.slane %v827_v42, 2 }
 0x283   : > { %v834_v45 = vrot.slane %v833_v43, 2 }
 0x284   : > { %v829_v46 = vadd.f32 %v828_v44, %v827_v42 }
 0x285   : > { %v835_v47 = vadd.f32 %v834_v45, %v833_v43 }
 0x286   : > { %v830_v48 = vrot.slane %v829_v46, 1 }
 0x287   : > { %v836_v49 = vrot.slane %v835_v47, 1 }
 0x288   : > { %v831_v50 = vadd.f32 %v830_v48, %v829_v46 }
 0x289   : > { %v837_v51 = vadd.f32 %v836_v49, %v835_v47 }
 0x28a   : > { %1657 = vrcp.f32 %v831_v50 }
 0x28b   : > { %1659 = vrcp.f32 %v837_v51 }
 0x290   : > { %v1658_v52 = vpop.eup %1657 }
 0x291   : > { %v1660_v53 = vpop.eup %1659  ;;  %v840_v54 = vmul.f32 %v1658_v52, %v1654_v38 }
 0x292   : > { %v841_v55 = vmul.f32 %v1660_v53, %v1656_v39 }
 0x293   : > { %v843_v56 = vpack.c.bf16 %v840_v54, %v840_v54 }
 0x294   : > { %v844_v57 = vpack.c.bf16 %v841_v55, %v841_v55 }
 0x295   : > { %v867_v58 = vsel %vm865_vm2, %v843_v56, 0 }
 0x296   : > { %879 = vmatpush.bf16.msrb.mxu0 %v867_v58  ;;  %v870_v59 = vsel %vm865_vm2, %v844_v57, 0 }
 0x297   : > { %893 = vmatpush.bf16.msrb.mxu1 %v870_v59 }
 0x299   : > { %1543 = vmatmul.msk.bf16.vlgmr.msrb.gmra.mxu0 %vm861_vm3, %v853_v60 }
 0x29a   : > { %1086 = vmatpush.bf16.msra.mxu0 %v1799_v8  ;;  %1544 = vmatmul.msk.bf16.vlgmr.msrb.gmra.mxu1 %vm861_vm3, %v853_v60  ;;  %v902_v8 = vld [vmem:[%s1964_s8 + $0x10] sm:$0xff]  ;;  %v1605_v60 = vld [vmem:[%s1967_s11 + $0x8] sm:$0xff] }
 0x29b   : > { %1105 = vmatpush.bf16.msra.mxu1 %v1801_v12  ;;  %v1601_v12 = vld [vmem:[%s1965_s9 + $0x8] sm:$0xff]  ;;  %1011 = vperm.xlu0 %1638, %v902_v8  }
 0x29c   : > { %986 = vperm.xlu2 %1637, %v902_v8  }
 0x29e   : > { %1087 = vmatpush.bf16.msra.mxu0 %v1804_v15  ;;  %v1603_v15 = vld [vmem:[%s1965_s9 + $0x18] sm:$0xff] }
 0x29f   : > { %1106 = vmatpush.bf16.msra.mxu1 %v1807_v16 }
 0x2a0   : > { %1641 = vxpose.binary.xlu1.c.b16.end [2/4] (short) (narrow) %v1603_v15, %v1601_v12, 32 }
 0x2a3   : > { %1015 = vperm.xlu0 %1638, %v1825_v21   ;;  %v923_v21 = vpop.trf.xlu1 }
 0x2a4   : > { %1639 = vset.pattern.permute.xlu2 %v1686_v19 }
 0x2a5   : > { %1007 = vperm.xlu2 %1639, %v1844_v29   ;;  %v1193_v29 = vld [vmem:[%s1966_s10 + $0x18] sm:$0xff] }
 0x2ab   : > { %1003 = vperm.xlu0 %1638, %v1837_v24   ;;  %v1192_v24 = vld [vmem:[%s1966_s10 + $0x10] sm:$0xff]  ;;  %v992_v9 = vpop.permute.xlu1 %991 }
 0x2ad   : > { %1646 = vset.pattern.permute.xlu2 %v1685_v2 }
 0x2ae   : > { %1206 = vperm.xlu2 %1646, %v1192_v24  }
 0x2b3   : > { %1647 = vset.pattern.permute.xlu0 %v1685_v2 }
 0x2b4   : > { %1211 = vperm.xlu0 %1647, %v1193_v29  }
 0x2b6   : > { %1648 = vset.pattern.permute.xlu2 %v1686_v19 }
 0x2b7   : > { %1231 = vperm.xlu2 %1648, %v1192_v24  }
 0x2bc   : > { %1196 = vperm.xlu0 %1647, %v1190_v23  }
 0x2bf   : > { %1235 = vperm.xlu2 %1648, %v1193_v29  }
 0x2c4   : > { %1650 = vset.pattern.permute.xlu0 %v1686_v19 }
 0x2c5   : > { %1223 = vperm.xlu0 %1650, %v1190_v23  }
 0x2c7   : > { %1649 = vset.pattern.permute.xlu2 %v1685_v2 }
 0x2c8   : > { %1201 = vperm.xlu2 %1649, %v1191_v6  }
 0x2cd   : > { %1652 = vset.pattern.permute.xlu0 %v1685_v2 }
 0x2d0   : > { %1651 = vset.pattern.permute.xlu2 %v1686_v19 }
 0x2d1   : > { %1227 = vperm.xlu2 %1651, %v1191_v6  }
 0x2f6   : > { %v987_v25 = vpop.permute.xlu2 %986 }
 0x2f7   : > { %1288 = vxpose.xlu2.c.b16.start [1/2] (short) (narrow) %v1604_v31, 16 }
 0x2ff   : > { %v1008_v37 = vpop.permute.xlu2 %1007 }
 0x307   : > { %1289 = vxpose.xlu2.c.b16.end [2/2] (short) (narrow) %v1605_v60, 16 }
 0x308   : > { %v1207_v12 = vpop.permute.xlu2 %1206 }
 0x30d   : > { %v1012_v17 = vpop.permute.xlu0 %1011 }
 0x315   : > { %v1016_v27 = vpop.permute.xlu0 %1015 }
 0x316   : > { %v881_v16 = vpop.f32.mrf.mxu0 }
 0x317   : > { %v895_v63 = vpop.f32.mrf.mxu1 }
 0x31d   : > { %v1004_v43 = vpop.permute.xlu0 %1003 }
 0x31e   : > { %v883_v0 = vpop.f32.mrf.mxu0 }
 0x31f   : > { %v906_v1 = vpack.c.bf16 %v883_v0, %v881_v16  ;;  %v897_v3 = vpop.f32.mrf.mxu1  ;;  %v1232_v16 = vpop.permute.xlu2 %1231 }
 0x320   : > { %v907_v4 = vpack.c.bf16 %v897_v3, %v895_v63 }
 0x321   : > { %943 = vmatpush.bf16.msra.mxu2 %v906_v1 }
 0x322   : > { %962 = vmatpush.bf16.msra.mxu3 %v907_v4 }
 0x324   : > { %1549 = vmatmul.msk.bf16.vlgmr.msra.gmra.mxu2 %vm714_vm1, %v922_v5 }
 0x325   : > { %1551 = vmatmul.msk.bf16.vlgmr.msra.gmra.mxu3 %vm714_vm1, %v922_v5 }
 0x326   : > { %v1212_v15 = vpop.permute.xlu0 %1211 }
 0x327   : > { %v1236_v0 = vpop.permute.xlu2 %1235 }
 0x32e   : > { %v1197_v63 = vpop.permute.xlu0 %1196 }
 0x32f   : > { %v1202_v24 = vpop.permute.xlu2 %1201 }
 0x334   : > { %1550 = vmatmul.msk.bf16.gmra.mxu2 %vm714_vm1, %v923_v21 }
 0x335   : > { %1552 = vmatmul.msk.bf16.gmra.mxu3 %vm714_vm1, %v923_v21 }
 0x337   : > { %v1224_v6 = vpop.permute.xlu0 %1223 }
 0x33c   : > { %v1901_v11 = vpop.trf.xlu1 }
 0x344   : > { %v1643_v18 = vpop.trf.xlu1 }
 0x345   : > { %1561 = vmatmul.msk.bf16.vlgmr.msra.gmra.mxu0 %vm624_vm0, %v1643_v18  ;;  %1563 = vmatmul.msk.bf16.vlgmr.msra.gmra.mxu1 %vm624_vm0, %v1643_v18 }
 0x34c   : > { %v1644_v26 = vpop.trf.xlu1 }
 0x354   : > { %v1645_v34 = vpop.trf.xlu1 }
 0x355   : > { %1562 = vmatmul.msk.bf16.gmra.mxu0 %vm624_vm0, %v1645_v34  ;;  %1564 = vmatmul.msk.bf16.gmra.mxu1 %vm624_vm0, %v1645_v34 }
 0x3a7   : > { %v945_v13 = vpop.f32.mrf.mxu2 }
 0x3a8   : > { %v964_v14 = vpop.f32.mrf.mxu3  ;;  %v994_v39 = vmul.f32 %v977_v7, %v945_v13 }
 0x3a9   : > { %v995_v42 = vmul.f32 %v977_v7, %v964_v14 }
 0x3aa   : > { %v1018_v50 = vadd.f32 %v1004_v43, %v994_v39 }
 0x3ab   : > { %v1019_v53 = vadd.f32 %v1004_v43, %v995_v42 }
 0x3ac   : > { %v1026_v61 = vmax.f32 %v1018_v50, 0.0 }
 0x3ad   : > { %v1027_v62 = vmax.f32 %v1019_v53, 0.0 }
 0x3af   : > { %v947_v20 = vpop.f32.mrf.mxu2 }
 0x3b0   : > { %v966_v22 = vpop.f32.mrf.mxu3  ;;  %v996_v35 = vmul.f32 %v982_v10, %v947_v20 }
 0x3b1   : > { %v997_v36 = vmul.f32 %v982_v10, %v966_v22 }
 0x3b2   : > { %v1020_v46 = vadd.f32 %v1008_v37, %v996_v35 }
 0x3b3   : > { %v1021_v48 = vadd.f32 %v1008_v37, %v997_v36 }
 0x3b4   : > { %v1028_v56 = vmax.f32 %v1020_v46, 0.0 }
 0x3b5   : > { %v1029_v58 = vmax.f32 %v1021_v48, 0.0 }
 0x3b6   : > { %v1042_v2 = vpack.c.bf16 %v1028_v56, %v1026_v61 }
 0x3b7   : > { %v950_v28 = vpop.f32.mrf.mxu2  ;;  %v1043_v8 = vpack.c.bf16 %v1029_v58, %v1027_v62 }
 0x3b8   : > { %v969_v30 = vpop.f32.mrf.mxu3  ;;  %v998_v32 = vmul.f32 %v987_v25, %v950_v28  ;;  %v1228_v28 = vpop.permute.xlu2 %1227 }
 0x3b9   : > { %v999_v33 = vmul.f32 %v987_v25, %v969_v30 }
 0x3ba   : > { %v1022_v40 = vadd.f32 %v1012_v17, %v998_v32 }
 0x3bb   : > { %v1023_v44 = vadd.f32 %v1012_v17, %v999_v33 }
 0x3bc   : > { %v1030_v51 = vmax.f32 %v1022_v40, 0.0 }
 0x3bd   : > { %v1031_v54 = vmax.f32 %v1023_v44, 0.0 }
 0x3bf   : > { %v952_v38 = vpop.f32.mrf.mxu2 }
 0x3c0   : > { %v1000_v19 = vmul.f32 %v992_v9, %v952_v38  ;;  %v971_v41 = vpop.f32.mrf.mxu3  ;;  %v1296_v62 = vpop.trf.xlu2 }
 0x3c1   : > { %v1001_v45 = vmul.f32 %v992_v9, %v971_v41 }
 0x3c2   : > { %v1024_v47 = vadd.f32 %v1016_v27, %v1000_v19  ;;  %v1089_v1 = vpop.f32.mrf.mxu0  ;;  %v1108_v3 = vpop.f32.mrf.mxu1 }
 0x3c3   : > { %v1025_v49 = vadd.f32 %v1016_v27, %v1001_v45  ;;  %v1270_v27 = vld [vmem:[%s1968_s12] sm:$0xff] }
 0x3c4   : > { %v1032_v52 = vmax.f32 %v1024_v47, 0.0  ;;  %1273 = vperm.xlu0 %1652, %v1270_v27  }
 0x3c5   : > { %v1033_v55 = vmax.f32 %v1025_v49, 0.0 }
 0x3c6   : > { %v1044_v57 = vpack.c.bf16 %v1032_v52, %v1030_v51 }
 0x3c7   : > { %v1045_v59 = vpack.c.bf16 %v1033_v55, %v1031_v54 }
 0x3c8   : > { %1158 = vmatpush.bf16.msrb.mxu2 %v1044_v57 }
 0x3c9   : > { %1177 = vmatpush.bf16.msrb.mxu3 %v1045_v59 }
 0x3ca   : > { %v1091_v9 = vpop.f32.mrf.mxu0 }
 0x3cc   : > { %1159 = vmatpush.bf16.msrb.mxu2 %v1042_v2 }
 0x3cd   : > { %1178 = vmatpush.bf16.msrb.mxu3 %v1043_v8 }
 0x3cf   : > { %1573 = vmatmul.msk.bf16.vlgmr.msrb.gmra.mxu2 %vm624_vm0, %v1901_v11 }
 0x3d0   : > { %1575 = vmatmul.msk.bf16.vlgmr.msrb.gmra.mxu3 %vm624_vm0, %v1901_v11  ;;  %v1110_v11 = vpop.f32.mrf.mxu1 }
 0x3d2   : > { %v1094_v32 = vpop.f32.mrf.mxu0 }
 0x3d8   : > { %v1113_v34 = vpop.f32.mrf.mxu1 }
 0x3da   : > { %v1096_v45 = vpop.f32.mrf.mxu0 }
 0x3df   : > { %1574 = vmatmul.msk.bf16.gmra.mxu2 %vm624_vm0, %v1644_v26 }
 0x3e0   : > { %1576 = vmatmul.msk.bf16.gmra.mxu3 %vm624_vm0, %v1644_v26  ;;  %v1115_v48 = vpop.f32.mrf.mxu1 }
 0x436   : > { %v1274_v2 = vpop.permute.xlu0 %1273 }
 0x452   : > { %v1161_v4 = vpop.f32.mrf.mxu2 }
 0x453   : > { %v1162_v5 = vadd.f32 %v1161_v4, %v1089_v1  ;;  %v1180_v21 = vpop.f32.mrf.mxu3 }
 0x454   : > { %v1181_v29 = vadd.f32 %v1180_v21, %v1108_v3 }
 0x455   : > { %v1214_v7 = vmul.f32 %v1197_v63, %v1162_v5 }
 0x456   : > { %v1215_v10 = vmul.f32 %v1197_v63, %v1181_v29 }
 0x457   : > { %v1238_v13 = vadd.f32 %v1224_v6, %v1214_v7 }
 0x458   : > { %v1239_v14 = vadd.f32 %v1224_v6, %v1215_v10 }
 0x459   : > { %v1246_v17 = vmax.f32 %v1238_v13, 0.0 }
 0x45a   : > { %v1247_v18 = vmax.f32 %v1239_v14, 0.0  ;;  %v1163_v20 = vpop.f32.mrf.mxu2 }
 0x45b   : > { %1254 = vst [vmem:[%s1928_s27] sm:$0xff] %v1246_v17  ;;  %v1164_v22 = vadd.f32 %v1163_v20, %v1091_v9  ;;  %v1182_v23 = vpop.f32.mrf.mxu3 }
 0x45c   : > { %1255 = vst [vmem:[%s1928_s27 + $0x8] sm:$0xff] %v1247_v18  ;;  %v1183_v25 = vadd.f32 %v1182_v23, %v1110_v11 }
 0x45d   : > { %v1216_v26 = vmul.f32 %v1202_v24, %v1164_v22 }
 0x45e   : > { %v1217_v30 = vmul.f32 %v1202_v24, %v1183_v25 }
 0x45f   : > { %v1240_v31 = vadd.f32 %v1228_v28, %v1216_v26 }
 0x460   : > { %v1241_v33 = vadd.f32 %v1228_v28, %v1217_v30 }
 0x461   : > { %v1248_v35 = vmax.f32 %v1240_v31, 0.0 }
 0x462   : > { %v1249_v36 = vmax.f32 %v1241_v33, 0.0  ;;  %v1166_v37 = vpop.f32.mrf.mxu2 }
 0x463   : > { %1256 = vst [vmem:[%s1928_s27 + $0x10] sm:$0xff] %v1248_v35  ;;  %v1167_v38 = vadd.f32 %v1166_v37, %v1094_v32  ;;  %v1185_v39 = vpop.f32.mrf.mxu3  ;;  %v1266_v60 = vpack.c.bf16 %v1248_v35, %v1246_v17 }
 0x464   : > { %1257 = vst [vmem:[%s1928_s27 + $0x18] sm:$0xff] %v1249_v36  ;;  %v1186_v40 = vadd.f32 %v1185_v39, %v1113_v34  ;;  %v1267_v61 = vpack.c.bf16 %v1249_v36, %v1247_v18 }
 0x465   : > { %v1218_v19 = vmul.f32 %v1207_v12, %v1167_v38 }
 0x466   : > { %v1219_v41 = vmul.f32 %v1207_v12, %v1186_v40 }
 0x467   : > { %v1242_v42 = vadd.f32 %v1232_v16, %v1218_v19 }
 0x468   : > { %v1243_v43 = vadd.f32 %v1232_v16, %v1219_v41 }
 0x469   : > { %v1250_v44 = vmax.f32 %v1242_v42, 0.0 }
 0x46a   : > { %v1251_v46 = vmax.f32 %v1243_v43, 0.0  ;;  %v1168_v47 = vpop.f32.mrf.mxu2 }
 0x46b   : > { %1258 = vst [vmem:[%s1928_s27 + $0x20] sm:$0xff] %v1250_v44  ;;  %v1169_v49 = vadd.f32 %v1168_v47, %v1096_v45  ;;  %v1187_v50 = vpop.f32.mrf.mxu3 }
 0x46c   : > { %1259 = vst [vmem:[%s1928_s27 + $0x28] sm:$0xff] %v1251_v46  ;;  %v1188_v51 = vadd.f32 %v1187_v50, %v1115_v48 }
 0x46d   : > { %v1220_v52 = vmul.f32 %v1212_v15, %v1169_v49 }
 0x46e   : > { %v1221_v53 = vmul.f32 %v1212_v15, %v1188_v51 }
 0x46f   : > { %v1244_v54 = vadd.f32 %v1236_v0, %v1220_v52 }
 0x470   : > { %v1245_v55 = vadd.f32 %v1236_v0, %v1221_v53 }
 0x471   : > { %v1252_v56 = vmax.f32 %v1244_v54, 0.0 }
 0x472   : > { %v1253_v57 = vmax.f32 %v1245_v55, 0.0 }
 0x473   : > { %1260 = vst [vmem:[%s1928_s27 + $0x30] sm:$0xff] %v1252_v56  ;;  %v1268_v58 = vpack.c.bf16 %v1252_v56, %v1250_v44 }
 0x474   : > { %1261 = vst [vmem:[%s1928_s27 + $0x38] sm:$0xff] %v1253_v57  ;;  %v1269_v59 = vpack.c.bf16 %v1253_v57, %v1251_v46 }
 0x475   : > { %1313 = vmatpush.bf16.msrb.mxu0 %v1268_v58 }
 0x476   : > { %1326 = vmatpush.bf16.msrb.mxu1 %v1269_v59 }
 0x479   : > { %1314 = vmatpush.bf16.msrb.mxu0 %v1266_v60 }
 0x47a   : > { %1327 = vmatpush.bf16.msrb.mxu1 %v1267_v61 }
 0x47c   : > { %1585 = vmatmul.msk.bf16.vlgmr.msrb.gmra.mxu0 %vm624_vm0, %v1296_v62 }
 0x47d   : > { %1586 = vmatmul.msk.bf16.vlgmr.msrb.gmra.mxu1 %vm624_vm0, %v1296_v62 }
 0x4f9   : > { %v1316_v8 = vpop.f32.mrf.mxu0 }
 0x4fa   : > { %v1329_v12 = vpop.f32.mrf.mxu1  ;;  %v1317_v15 = vadd.f32 %v1316_v8, %v1274_v2 }
 0x4fb   : > { %v1330_v16 = vadd.f32 %v1329_v12, %v1274_v2 }
 0x4fc   : > { %1333 = vst [vmem:[%s563_s21] sm:$0xff] %v1317_v15 }
 0x4fd   : > { %1334 = vst [vmem:[%s563_s21 + $0x8] sm:$0xff] %v1330_v16 }
 0x501   : > { %v1318_v63 = vpop.f32.mrf.mxu0 }
 0x502   : > { %v1331_v0 = vpop.f32.mrf.mxu1 }
 0x503 PF: > { %s25_s15 = sadd.s32 1, %s1683_s15   ;;  %s1971_s29 = smov %s1679_s30 }
 0x504   : > { %p22_p5 = scmp.ge.s32.totalorder %s25_s15, 4   ;;  %s1972_s30 = smov %s1974_s16 }
 0x506   :  { %24 = sbr.rel (!%p22_p5) target bundleno = 2 (0x2), region = 120 }

// kernel: ocr_block_forward.2
= control target key start
LH: loop header
LB: loop body
LE: loop exit
PB: predicated region body
PF: predicated region fallthrough
CT: control target
= control target key end

     0   :  { %s2090_s29 = smov 0   ;;  %s2502_s0 = inlined_call_operand.vmem [shape: bf16[2,8,290], index: 0, kind: input, shape index: {}]   ;;  %s2503_s1 = inlined_call_operand.vmem [shape: bf16[9,8,32], index: 1, kind: input, shape index: {}]   ;;  %s2504_s2 = inlined_call_operand.vmem [shape: f32[32,2], index: 2, kind: input, shape index: {}]   ;;  %s2505_s3 = inlined_call_operand.vmem [shape: bf16[8,8], index: 3, kind: input, shape index: {}]   ;;  %s2506_s4 = inlined_call_operand.vmem [shape: f32[8,2], index: 4, kind: input, shape index: {}]   ;;  %s2507_s5 = inlined_call_operand.vmem [shape: bf16[8,8], index: 5, kind: input, shape index: {}]   ;;  %s2508_s6 = inlined_call_operand.vmem [shape: f32[8,1], index: 6, kind: input, shape index: {}]   ;;  %s2509_s7 = inlined_call_operand.vmem [shape: bf16[32,32], index: 7, kind: input, shape index: {}]   ;;  %s2510_s8 = inlined_call_operand.vmem [shape: f32[2,32], index: 8, kind: input, shape index: {}]   ;;  %s2511_s9 = inlined_call_operand.vmem [shape: bf16[16,16], index: 9, kind: input, shape index: {}]   ;;  %s2512_s10 = inlined_call_operand.vmem [shape: f32[2,16], index: 10, kind: input, shape index: {}]   ;;  %s2513_s11 = inlined_call_operand.vmem [shape: bf16[2,32,256], index: 11, kind: output, shape index: {0}]   ;;  %s2514_s12 = inlined_call_operand.vmem [shape: f32[2,8,256], index: 12, kind: output, shape index: {1}]   ;;  %s2515_s13 = inlined_call_operand.vmem [shape: bf16[2,8,16], index: 13, kind: output, shape index: {2}]   ;;  %s2516_s14 = inlined_call_operand.vmem [shape: bf16[2,8,16], index: 14, kind: output, shape index: {3}]  }
   0x1 LB: > { %s1862_s30 = sadd.s32 4294967295, %s2002_s29   ;;  %p1866_p0 = scmp.ge.s32.totalorder %s2002_s29, 1  ;;  %s2002_s29 = sphi %s2090_s29, %s25_s29  }
   0x2   : > { %p419_p1 = scmp.lt.s32.totalorder %s2002_s29, 3 }
   0x4   : > { %p420_p2 = pnand %p1866_p0, %p419_p1 }
   0x5   : > { %s2005_s19 = smov (!%p420_p2), 2   ;;  %p478_p3 = scmp.lt.s32.totalorder (!%p420_p2), %s1862_s30, 1 }
   0x6   : > { %423 = sbr.rel (%p420_p2) target bundleno = 1289 (0x509), region = 64  ;;  %s2006_s24 = smov (!%p420_p2), 112  }
   0x7   : > { %s2007_s25 = smov (!%p420_p2), 127   ;;  %s2008_s26 = smov (!%p420_p2), 110  }
   0x8   : > { %s2009_s27 = smov (!%p420_p2), 95   ;;  %s2010_s28 = smov (!%p420_p2), 111  }
   0xb   : > { %v600_v0 = vld [vmem:[%s2503_s1] sm:$0xf]  ;;  %v1888_v1 = vld [vmem:[%s2503_s1 + $0xc] sm:$0xf]  ;;  %v506_v2 = vlaneseq  ;;  %v2004_v11 = vmov 0   ;;  %s2522_s30 = smov (!%p478_p3, %s1862_s30), 1 }
   0xc   : > { %1963 = vxpose.binary.xlu1.c.b16.start.end [1/2] (short) (narrow) %v1888_v1, %v600_v0, 32  ;;  %s1943_s20 = smul.u32 12, %s2522_s30  ;;  %vm577_vm10 = vcmask 15360   ;;  %v582_v30 = vunpack.c.l.b16 %v2004_v11  ;;  %v583_v31 = vunpack.c.h.b16 %v2004_v11  ;;  %vm643_vm14 = vcmask 1043456   ;;  %v1898_v47 = vld [vmem:[%s2503_s1 + $0x14] sm:$0xf] }
   0xd   : > { %v507_v3 = vand.u32 127, %v506_v2  ;;  %v1908_v48 = vld [vmem:[%s2503_s1 + $0x1c] sm:$0xf]  ;;  %v1874_v49 = vld [vmem:[%s2503_s1 + $0x4] sm:$0xf]  ;;  %s1938_s22 = sshll.u32 %s2522_s30, 5 }
   0xe   : > { %s482_s23 = scalar_lea.vmem %s2502_s0, %s1943_s20  ;;  %v1883_v50 = vld [vmem:[%s2503_s1 + $0x8] sm:$0xf]  ;;  %v1434_v63 = vld [vmem:[%s2505_s3] sm:$0xf]  ;;  %s2014_s20 = smov 94  }
   0xf   : > { %v508_v4 = vadd.s32 128, %v507_v3  ;;  %v514_v5 = vand.u32 15, %v507_v3  ;;  %v509_v6 = vadd.s32 256, %v507_v3  ;;  %v504_v14 = vld [vmem:[%s482_s23] sm:$0xff]  ;;  %v505_v18 = vld [vmem:[%s482_s23 + $0x8] sm:$0xf] }
  0x10   : > { %v622_v24 = vunpack.c.h.b16 %v504_v14  ;;  %v623_v26 = vunpack.c.l.b16 %v505_v18  ;;  %v621_v40 = vunpack.c.l.b16 %v504_v14 }
  0x11   : > { %v521_v7 = vand.u32 15, %v508_v4  ;;  %vm559_vm0 = vcmp.eq.s32.totalorder %v514_v5, 15  ;;  %v528_v8 = vand.u32 15, %v509_v6  ;;  %vm2104_vm1 = vcmp.eq.s32.totalorder %v514_v5, 0 }
  0x12   : > { %v2140_v25 = vpack.c.b16 %v622_v24, %v622_v24  ;;  %v626_v27 = vpack.c.b16 %v623_v26, %v623_v26  ;;  %v2156_v41 = vpack.c.b16 %v621_v40, %v621_v40 }
  0x13   : > { %vm560_vm2 = vcmp.eq.s32.totalorder %v521_v7, 15  ;;  %vm2108_vm3 = vcmp.eq.s32.totalorder %v521_v7, 0  ;;  %vm561_vm5 = vcmp.eq.s32.totalorder %v528_v8, 15  ;;  %vm548_vm8 = vcmp.eq.s32.totalorder %v528_v8, 0 }
  0x14   : > { %vm568_vm4 = vmpackc.low %vm560_vm2, %vm559_vm0  ;;  %vm879_vm2 = vcmask 916480  }
  0x15   : > { %v570_v12 = vsel %vm568_vm4, 65537, %v2004_v11  ;;  %vm555_vm6 = vmpackc.low %vm2108_vm3, %vm2104_vm1  ;;  %vm636_vm3 = vcmask 64512   ;;  %vm1049_vm4 = vcmask 900096  }
  0x16   : > { %572 = vrot.lane.b32.xlu0 %v570_v12, %s2005_s19  ;;  %vm569_vm7 = vmpackc.low %vm561_vm5, %vm561_vm5  ;;  %v557_v15 = vsel %vm555_vm6, 0, %v504_v14  ;;  %vm1219_vm5 = vcmask 777216   ;;  %vm633_vm6 = vcmask 1039360  }
  0x17   : > { %v571_v13 = vsel %vm569_vm7, 65537, %v2004_v11  ;;  %v706_v16 = vunpack.c.h.b16 %v557_v15  ;;  %vm556_vm9 = vmpackc.low %vm548_vm8, %vm548_vm8  ;;  %v705_v22 = vunpack.c.l.b16 %v557_v15  ;;  %vm964_vm7 = vcmask 908288  }
  0x18   : > { %v558_v19 = vsel %vm556_vm9, 0, %v505_v18  ;;  %vm791_vm8 = vcmask 1031168   ;;  %vm1134_vm9 = vcmask 785408  }
  0x19   : > { %v2128_v17 = vpack.c.b16 %v706_v16, %v706_v16  ;;  %v871_v20 = vunpack.c.l.b16 %v558_v19  ;;  %v2136_v23 = vpack.c.b16 %v705_v22, %v705_v22 }
  0x1b   : > { %875 = vrot.lane.b32.xlu2 %v2128_v17, %s2006_s24  ;;  %v2132_v21 = vpack.c.b16 %v871_v20, %v871_v20  ;;  %v719_v44 = vsel %vm643_vm14, %v2128_v17, 0  ;;  %v716_v58 = vsel %vm643_vm14, %v2136_v23, 0 }
  0x1c   : > { %747 = vmatpush.bf16.msra.mxu3 %v719_v44  ;;  %728 = vmatpush.bf16.msra.mxu2 %v716_v58 }
  0x1e   : > { %574 = vrot.lane.b32.xlu0 %v571_v13, %s2005_s19 }
  0x23   : > { %877 = vrot.lane.b32.xlu2 %v2132_v21, %s2006_s24 }
  0x75   : > { %v876_v52 = vpop.permute.xlu2 %875 }
  0x76   : > { %873 = vrot.lane.b32.xlu1 %v2136_v23, %s2006_s24 }
  0x7d   : > { %v878_v56 = vpop.permute.xlu2 %877 }
  0x7e   : > { %629 = vrot.lane.b32.xlu1 %v2140_v25, %s2007_s25  ;;  %v881_v57 = vsel %vm879_vm2, %v876_v52, %v878_v56 }
  0x7f   : > { %v892_v59 = vsel %vm643_vm14, %v881_v57, 0 }
  0x80   : > { %920 = vmatpush.bf16.msrb.mxu3 %v892_v59 }
  0x86   : > { %631 = vrot.lane.b32.xlu1 %v626_v27, %s2007_s25 }
  0x88   : > { %v573_v28 = vpop.permute.xlu0 %572 }
  0x89   : > { %v576_v29 = vrot.slane %v573_v28, 4 }
  0x8b   : > { %v578_v32 = vsel %vm577_vm10, %v576_v29, %v573_v28 }
  0x8c   : > { %v580_v33 = vunpack.c.l.b16 %v578_v32  ;;  %v581_v34 = vunpack.c.h.b16 %v578_v32 }
  0x8e   : > { %vm584_vm11 = vcmp.ne.s32.totalorder %v580_v33, %v582_v30  ;;  %vm585_vm12 = vcmp.ne.s32.totalorder %v581_v34, %v583_v31  ;;  %v2240_v33 = vld [vmem:[%s2506_s4] sm:$0xff] }
  0x8f   : > { %vm586_vm13 = vmpackc.low %vm585_vm12, %vm584_vm11 }
  0x90   : > { %v594_v35 = vsel %vm586_vm13, 0, %v504_v14  ;;  %v575_v42 = vpop.permute.xlu0 %574 }
  0x91   : > { %v779_v36 = vunpack.c.l.b16 %v594_v35  ;;  %v780_v37 = vunpack.c.h.b16 %v594_v35  ;;  %v579_v43 = vsel %vm577_vm10, %v576_v29, %v575_v42  ;;  %vm1304_vm10 = vcmask 769024  }
  0x92   : > { %v587_v45 = vunpack.c.l.b16 %v579_v43  ;;  %v588_v46 = vunpack.c.h.b16 %v579_v43 }
  0x93   : > { %v2148_v38 = vpack.c.b16 %v779_v36, %v779_v36  ;;  %v2150_v39 = vpack.c.b16 %v780_v37, %v780_v37 }
  0x94   : > { %vm591_vm15 = vcmp.ne.s32.totalorder %v587_v45, %v582_v30  ;;  %vm592_vm0 = vcmp.ne.s32.totalorder %v588_v46, %v583_v31  ;;  %v1893_v30 = vld [vmem:[%s2503_s1 + $0x10] sm:$0xf]  ;;  %v1903_v31 = vld [vmem:[%s2503_s1 + $0x18] sm:$0xf] }
  0x95   : > { %1043 = vrot.lane.b32.xlu0 %v2148_v38, %s2008_s26  ;;  %1045 = vrot.lane.b32.xlu2 %v2150_v39, %s2008_s26  ;;  %vm593_vm1 = vmpackc.low %vm592_vm0, %vm591_vm15  ;;  %vm1650_vm15 = vcmask 261120   ;;  %vm1682_vm0 = vcmask 130048  }
  0x96   : > { %v595_v51 = vsel %vm593_vm1, 0, %v505_v18  ;;  %vm1705_vm1 = vcmask 125952  }
  0x97   : > { %v781_v53 = vunpack.c.l.b16 %v595_v51 }
  0x99   : > { %v2178_v55 = vpack.c.b16 %v781_v53, %v781_v53 }
  0x9d   : > { %1213 = vrot.lane.b32.xlu0 %v2156_v41, %s2009_s27 }
  0xa5   : > { %1215 = vrot.lane.b32.xlu0 %v2140_v25, %s2009_s27 }
  0xad   : > { %1217 = vrot.lane.b32.xlu0 %v626_v27, %s2009_s27  ;;  %s2011_s27 = smov 126  }
  0xb5   : > { %958 = vrot.lane.b32.xlu0 %v2156_v41, %s2010_s28 }
  0xb8   : > { %v1964_v54 = vpop.trf.xlu1 }
  0xb9   : > { %1879 = vmatmul.msk.bf16.vlgmr.msra.gmra.mxu2 %vm636_vm3, %v1964_v54  ;;  %1881 = vmatmul.msk.bf16.vlgmr.msra.gmra.mxu3 %vm636_vm3, %v1964_v54 }
  0xbb   : > { %1968 = vxpose.binary.xlu2.c.b16.start.end [1/2] (short) (narrow) %v1908_v48, %v1898_v47, 32 }
  0xbc   : > { %1973 = vxpose.binary.xlu1.c.b16.start.end [1/2] (short) (narrow) %v1883_v50, %v1874_v49, 32 }
  0xbd   : > { %962 = vrot.lane.b32.xlu0 %v626_v27, %s2010_s28  ;;  %v2012_v27 = vmov 1  }
  0xc0   : > { %v1965_v60 = vpop.trf.xlu1 }
  0xc5   : > { %1047 = vrot.lane.b32.xlu0 %v2178_v55, %s2008_s26 }
  0xc8   : > { %v1966_v61 = vpop.trf.xlu1 }
  0xc9   : > { %1880 = vmatmul.msk.bf16.gmra.mxu2 %vm636_vm3, %v1966_v61  ;;  %1882 = vmatmul.msk.bf16.gmra.mxu3 %vm636_vm3, %v1966_v61 }
  0xd0   : > { %v1967_v62 = vpop.trf.xlu1 }
  0xd9   : > { %1891 = vmatmul.msk.bf16.vlgmr.msrb.gmra.mxu3 %vm636_vm3, %v1965_v60 }
  0xe7   : > { %1435 = vxpose.xlu0.c.b16.start.end [1/1] (short) (narrow) %v1434_v63, 16 }
  0xe8   : > { %v874_v0 = vpop.permute.xlu1 %873 }
  0xe9   : > { %v880_v1 = vsel %vm879_vm2, %v874_v0, %v876_v52  ;;  %1892 = vmatmul.msk.bf16.gmra.mxu3 %vm636_vm3, %v1967_v62  ;;  %v1495_v52 = vld [vmem:[%s2507_s5] sm:$0xf] }
  0xea   : > { %v889_v2 = vsel %vm643_vm14, %v880_v1, 0 }
  0xeb   : > { %901 = vmatpush.bf16.msrb.mxu2 %v889_v2 }
  0xee   : > { %1889 = vmatmul.msk.bf16.vlgmr.msrb.gmra.mxu2 %vm636_vm3, %v1965_v60 }
  0xef   : > { %v1046_v3 = vpop.permute.xlu2 %1045 }
  0xf0   : > { %v2207_v20 = vpop.permute.xlu1 %629 }
  0xf8   : > { %v632_v24 = vpop.permute.xlu1 %631 }
  0xfe   : > { %1890 = vmatmul.msk.bf16.gmra.mxu2 %vm636_vm3, %v1967_v62 }
 0x107   : > { %v1044_v4 = vpop.permute.xlu0 %1043 }
 0x108   : > { %v1050_v5 = vsel %vm1049_vm4, %v1044_v4, %v1046_v3 }
 0x109   : > { %v1059_v6 = vsel %vm643_vm14, %v1050_v5, 0 }
 0x10a   : > { %1071 = vmatpush.bf16.msra.mxu2 %v1059_v6 }
 0x10f   : > { %v1214_v7 = vpop.permute.xlu0 %1213 }
 0x117   : > { %v1216_v8 = vpop.permute.xlu0 %1215 }
 0x118   : > { %v1220_v9 = vsel %vm1219_vm5, %v1214_v7, %v1216_v8 }
 0x119   : > { %v1229_v10 = vsel %vm643_vm14, %v1220_v9, 0 }
 0x11a   : > { %1241 = vmatpush.bf16.msrb.mxu2 %v1229_v10 }
 0x11f   : > { %v1218_v12 = vpop.permute.xlu0 %1217 }
 0x120   : > { %v1221_v15 = vsel %vm1219_vm5, %v1216_v8, %v1218_v12 }
 0x121   : > { %v1232_v22 = vsel %vm643_vm14, %v1221_v15, 0 }
 0x126   : > { %785 = vrot.lane.b32.xlu1 %v2148_v38, %s2011_s27 }
 0x127   : > { %v959_v13 = vpop.permute.xlu0 %958 }
 0x12f   : > { %v963_v14 = vpop.permute.xlu0 %962 }
 0x134   : > { %960 = vrot.lane.b32.xlu2 %v2140_v25, %s2010_s28  ;;  %v635_v25 = vsel %vm633_vm6, %v2207_v20, %v632_v24  ;;  %s2013_s28 = smov 96  }
 0x135   : > { %v648_v26 = vsel %vm643_vm14, %v635_v25, 0 }
 0x136   : > { %676 = vmatpush.bf16.msra.mxu1 %v648_v26 }
 0x137   : > { %v1048_v16 = vpop.permute.xlu0 %1047 }
 0x138   : > { %v1051_v18 = vsel %vm1049_vm4, %v1046_v3, %v1048_v16  ;;  %v599_v16 = vld [vmem:[%s2504_s2 + $0x18] sm:$0xff] }
 0x139   : > { %v1062_v19 = vsel %vm643_vm14, %v1051_v18, 0 }
 0x13a   : > { %1090 = vmatpush.bf16.msra.mxu3 %v1062_v19 }
 0x13c   : > { %787 = vrot.lane.b32.xlu2 %v2150_v39, %s2011_s27  ;;  %v2259_v42 = vpop.f32.mrf.mxu3  ;;  %v2261_v43 = vpop.f32.mrf.mxu2 }
 0x13e   : > { %1260 = vmatpush.bf16.msrb.mxu3 %v1232_v22 }
 0x144   : > { %789 = vrot.lane.b32.xlu2 %v2178_v55, %s2011_s27  ;;  %v2263_v45 = vpop.f32.mrf.mxu3  ;;  %v2265_v46 = vpop.f32.mrf.mxu2  ;;  %s2446_s27 = scalar_lea.vmem %s2513_s11, %s1938_s22 }
 0x14c   : > { %v2273_v50 = vpop.f32.mrf.mxu3  ;;  %v2275_v51 = vpop.f32.mrf.mxu2 }
 0x14e   : > { %1984 = vset.pattern.permute.xlu0 %v2012_v27 }
 0x154   : > { %v2280_v53 = vpop.f32.mrf.mxu3  ;;  %v2282_v54 = vpop.f32.mrf.mxu2 }
 0x155   : > { %627 = vrot.lane.b32.xlu0 %v2156_v41, %s2007_s25 }
 0x15c   : > { %v1969_v28 = vpop.trf.xlu2  ;;  %v2285_v56 = vpop.f32.mrf.mxu3 }
 0x15d   : > { %1128 = vrot.lane.b32.xlu0 %v2136_v23, %s2013_s28  ;;  %1901 = vmatmul.msk.bf16.vlgmr.msra.gmra.mxu3 %vm636_vm3, %v1969_v28 }
 0x15e   : > { %1899 = vmatmul.msk.bf16.vlgmr.msra.gmra.mxu2 %vm636_vm3, %v1969_v28 }
 0x164   : > { %v1970_v29 = vpop.trf.xlu2  ;;  %v2289_v59 = vpop.f32.mrf.mxu3 }
 0x165   : > { %1130 = vrot.lane.b32.xlu0 %v2128_v17, %s2013_s28 }
 0x168   : > { %v2228_v32 = vpop.trf.xlu1 }
 0x169   : > { %1877 = vmatmul.msk.bf16.vlgmr.msra.gmra.mxu1 %vm636_vm3, %v2228_v32 }
 0x16a   : > { %1978 = vxpose.binary.xlu2.c.b16.start.end [1/2] (short) (narrow) %v1903_v31, %v1893_v30, 32 }
 0x16c   : > { %v1971_v23 = vpop.trf.xlu2  ;;  %v2301_v2 = vpop.f32.mrf.mxu3 }
 0x16d   : > { %1132 = vrot.lane.b32.xlu0 %v2132_v21, %s2013_s28  ;;  %1902 = vmatmul.msk.bf16.gmra.mxu3 %vm636_vm3, %v1971_v23  ;;  %v1913_v21 = vld [vmem:[%s2503_s1 + $0x20] sm:$0xf]  ;;  %s1939_s28 = sshll.u32 %s2522_s30, 4 }
 0x16e   : > { %1900 = vmatmul.msk.bf16.gmra.mxu2 %vm636_vm3, %v1971_v23  ;;  %1282 = vxpose.xlu1.c.b16.start.end [1/1] (short) (narrow) %v1913_v21, 32  ;;  %s492_s17 = scalar_lea.vmem %s2514_s12, %s1939_s28 }
 0x170   : > { %v2235_v17 = vpop.trf.xlu1 }
 0x171   : > { %v2287_v57 = vpop.f32.mrf.mxu2 }
 0x174   : > { %v1972_v35 = vpop.trf.xlu2  ;;  %v2306_v6 = vpop.f32.mrf.mxu3 }
 0x175   : > { %1488 = vperm.xlu0 %1984, %v2240_v33  }
 0x178   : > { %v2243_v34 = vpop.trf.xlu1 }
 0x179   : > { %1878 = vmatmul.msk.bf16.gmra.mxu1 %vm636_vm3, %v2243_v34  ;;  %v2291_v60 = vpop.f32.mrf.mxu2 }
 0x17d   : > { %1298 = vrot.lane.b32.xlu0 %v2148_v38, %s2014_s20  ;;  %1911 = vmatmul.msk.bf16.vlgmr.msrb.gmra.mxu3 %vm636_vm3, %v1970_v29 }
 0x17e   : > { %1909 = vmatmul.msk.bf16.vlgmr.msrb.gmra.mxu2 %vm636_vm3, %v1970_v29 }
 0x181   : > { %v2303_v3 = vpop.f32.mrf.mxu2 }
 0x185   : > { %1300 = vrot.lane.b32.xlu0 %v2150_v39, %s2014_s20 }
 0x189   : > { %v2308_v7 = vpop.f32.mrf.mxu2 }
 0x18d   : > { %1302 = vrot.lane.b32.xlu0 %v2178_v55, %s2014_s20  ;;  %1912 = vmatmul.msk.bf16.gmra.mxu3 %vm636_vm3, %v1972_v35  ;;  %v1977_v55 = vpop.trf.xlu1 }
 0x18e   : > { %v961_v36 = vpop.permute.xlu2 %960  ;;  %1910 = vmatmul.msk.bf16.gmra.mxu2 %vm636_vm3, %v1972_v35 }
 0x18f   : > { %v965_v37 = vsel %vm964_vm7, %v959_v13, %v961_v36  ;;  %v966_v38 = vsel %vm964_vm7, %v961_v36, %v963_v14 }
 0x190   : > { %v974_v40 = vsel %vm643_vm14, %v965_v37, 0  ;;  %v977_v41 = vsel %vm643_vm14, %v966_v38, 0 }
 0x191   : > { %1461 = vmatpush.bf16.msra.mxu2 %v974_v40  ;;  %1474 = vmatpush.bf16.msra.mxu3 %v977_v41 }
 0x193   : > { %v1443_v44 = vpop.trf.xlu0 }
 0x196   : > { %v788_v39 = vpop.permute.xlu2 %787 }
 0x198   : > { %v786_v58 = vpop.permute.xlu1 %785 }
 0x199   : > { %v792_v62 = vsel %vm791_vm8, %v786_v58, %v788_v39 }
 0x19a   : > { %v801_v1 = vsel %vm643_vm14, %v792_v62, 0 }
 0x19d   : > { %1919 = vmatmul.msk.bf16.vlgmr.msra.gmra.mxu3 %vm636_vm3, %v1443_v44 }
 0x19e   : > { %v790_v47 = vpop.permute.xlu2 %789  ;;  %1918 = vmatmul.msk.bf16.vlgmr.msra.gmra.mxu2 %vm636_vm3, %v1443_v44 }
 0x19f   : > { %v793_v48 = vsel %vm791_vm8, %v788_v39, %v790_v47 }
 0x1a0   : > { %v804_v49 = vsel %vm643_vm14, %v793_v48, 0 }
 0x1a1   : > { %832 = vmatpush.bf16.msrb.mxu1 %v804_v49 }
 0x1a4   : > { %1886 = vmatmul.msk.bf16.vlgmr.msrb.gmra.mxu1 %vm636_vm3, %v2235_v17 }
 0x1a5   : > { %1005 = vmatpush.bf16.msra.mxu1 %v977_v41 }
 0x1af   : > { %1504 = vxpose.xlu0.c.b16.start.end [1/1] (short) (narrow) %v1495_v52, 16 }
 0x1b4   : > { %1887 = vmatmul.msk.bf16.gmra.mxu1 %vm636_vm3, %v1977_v55 }
 0x1c1   : > { %1986 = vset.pattern.permute.xlu1 %v2004_v11 }
 0x1c7   : > { %v628_v61 = vpop.permute.xlu0 %627 }
 0x1c8   : > { %v634_v63 = vsel %vm633_vm6, %v628_v61, %v2207_v20 }
 0x1c9   : > { %v645_v0 = vsel %vm643_vm14, %v634_v63, 0 }
 0x1ca   : > { %657 = vmatpush.bf16.msra.mxu0 %v645_v0 }
 0x1cc   : > { %1983 = vset.pattern.permute.xlu2 %v2004_v11 }
 0x1cd   : > { %1875 = vmatmul.msk.bf16.vlgmr.msra.gmra.mxu0 %vm636_vm3, %v2228_v32 }
 0x1ce   : > { %813 = vmatpush.bf16.msrb.mxu0 %v801_v1 }
 0x1cf   : > { %v1129_v4 = vpop.permute.xlu0 %1128 }
 0x1d2   : > { %986 = vmatpush.bf16.msra.mxu0 %v974_v40 }
 0x1d7   : > { %v1131_v5 = vpop.permute.xlu0 %1130 }
 0x1d8   : > { %v1135_v19 = vsel %vm1134_vm9, %v1129_v4, %v1131_v5 }
 0x1d9   : > { %v1144_v20 = vsel %vm643_vm14, %v1135_v19, 0 }
 0x1dd   : > { %1876 = vmatmul.msk.bf16.gmra.mxu0 %vm636_vm3, %v2243_v34 }
 0x1df   : > { %v1133_v8 = vpop.permute.xlu0 %1132 }
 0x1e0   : > { %v1136_v9 = vsel %vm1134_vm9, %v1131_v5, %v1133_v8  ;;  %v2312_v10 = vpop.f32.mrf.mxu3 }
 0x1e1   : > { %v1147_v12 = vsel %vm643_vm14, %v1136_v9, 0  ;;  %v2315_v13 = vpop.f32.mrf.mxu2 }
 0x1e2   : > { %1175 = vmatpush.bf16.msrb.mxu1 %v1147_v12 }
 0x1e3   : > { %1482 = vperm.xlu2 %1983, %v2240_v33  }
 0x1e6   : > { %v678_v29 = vpop.f32.mrf.mxu1 }
 0x1e7   : > { %v2318_v14 = vpop.permute.xlu0 %1488 }
 0x1e8   : > { %v2320_v15 = vpop.f32.mrf.mxu3 }
 0x1e9   : > { %v2325_v18 = vpop.f32.mrf.mxu2 }
 0x1eb   : > { %1382 = vperm.xlu2 %1983, %v599_v16  }
 0x1ed   : > { %1884 = vmatmul.msk.bf16.vlgmr.msrb.gmra.mxu0 %vm636_vm3, %v2235_v17 }
 0x1ee   : > { %1156 = vmatpush.bf16.msrb.mxu0 %v1144_v20  ;;  %v680_v23 = vpop.f32.mrf.mxu1 }
 0x1ef   : > { %v1299_v25 = vpop.permute.xlu0 %1298  ;;  %v752_v0 = vadd.f32 %v2263_v45, %v680_v23 }
 0x1f0   : > { %v2330_v22 = vpop.f32.mrf.mxu3 }
 0x1f1   : > { %v2332_v24 = vpop.f32.mrf.mxu2 }
 0x1f3   : > { %1987 = vset.pattern.permute.xlu2 %v2012_v27 }
 0x1f6   : > { %v683_v40 = vpop.f32.mrf.mxu1 }
 0x1f7   : > { %v1301_v30 = vpop.permute.xlu0 %1300  ;;  %v755_v9 = vadd.f32 %v2273_v50, %v683_v40 }
 0x1f8   : > { %v2335_v26 = vpop.f32.mrf.mxu3  ;;  %v1305_v35 = vsel %vm1304_vm10, %v1299_v25, %v1301_v30  ;;  %v596_v25 = vld [vmem:[%s2504_s2] sm:$0xff] }
 0x1f9   : > { %v2337_v28 = vpop.f32.mrf.mxu2  ;;  %v1314_v38 = vsel %vm643_vm14, %v1305_v35, 0 }
 0x1fd   : > { %1885 = vmatmul.msk.bf16.gmra.mxu0 %vm636_vm3, %v1977_v55  ;;  %v750_v55 = vadd.f32 %v2259_v42, %v678_v29  ;;  %v598_v42 = vld [vmem:[%s2504_s2 + $0x10] sm:$0xff] }
 0x1fe   : > { %v2359_v48 = vpop.f32.mrf.mxu1  ;;  %1402 = vperm.xlu2 %1987, %v598_v42   ;;  %1377 = vperm.xlu1 %1986, %v598_v42  }
 0x1ff   : > { %v1303_v17 = vpop.permute.xlu0 %1302 }
 0x200   : > { %v2340_v31 = vpop.f32.mrf.mxu3  ;;  %v1306_v34 = vsel %vm1304_vm10, %v1301_v30, %v1303_v17 }
 0x201   : > { %v2342_v32 = vpop.f32.mrf.mxu2  ;;  %v1317_v37 = vsel %vm643_vm14, %v1306_v34, 0 }
 0x206   : > { %1406 = vperm.xlu2 %1987, %v599_v16  }
 0x208   : > { %v2344_v33 = vpop.f32.mrf.mxu3 }
 0x209   : > { %v2346_v21 = vpop.f32.mrf.mxu2 }
 0x20b   : > { %v1979_v36 = vpop.trf.xlu2 }
 0x20c   : > { %1896 = vmatmul.msk.bf16.vlgmr.msra.gmra.mxu1 %vm636_vm3, %v1979_v36 }
 0x20d   : > { %1345 = vmatpush.bf16.msra.mxu1 %v1317_v37  ;;  %1894 = vmatmul.msk.bf16.vlgmr.msra.gmra.mxu0 %vm636_vm3, %v1979_v36  ;;  %v597_v36 = vld [vmem:[%s2504_s2 + $0x8] sm:$0xff] }
 0x20e   : > { %1326 = vmatpush.bf16.msra.mxu0 %v1314_v38  ;;  %1988 = vset.pattern.permute.xlu2 %v2004_v11 }
 0x20f   : > { %1367 = vperm.xlu2 %1988, %v596_v25  }
 0x210   : > { %v2352_v41 = vpop.f32.mrf.mxu3 }
 0x211   : > { %v2354_v39 = vpop.f32.mrf.mxu2 }
 0x213   : > { %v1980_v44 = vpop.trf.xlu2 }
 0x216   : > { %1985 = vset.pattern.permute.xlu0 %v2004_v11 }
 0x217   : > { %1372 = vperm.xlu2 %1988, %v597_v36  }
 0x218   : > { %v2357_v47 = vpop.f32.mrf.mxu3 }
 0x219   : > { %v2361_v49 = vpop.f32.mrf.mxu2 }
 0x21a   : > { %v1290_v11 = vpop.trf.xlu1 }
 0x21b   : > { %v1981_v52 = vpop.trf.xlu2 }
 0x21c   : > { %1897 = vmatmul.msk.bf16.gmra.mxu1 %vm636_vm3, %v1981_v52 }
 0x21d   : > { %1895 = vmatmul.msk.bf16.gmra.mxu0 %vm636_vm3, %v1981_v52 }
 0x21f   : > { %1989 = vset.pattern.permute.xlu2 %v2012_v27 }
 0x220   : > { %v1476_v58 = vpop.f32.mrf.mxu3  ;;  %1394 = vperm.xlu2 %1989, %v596_v25  }
 0x221   : > { %v834_v61 = vpop.f32.mrf.mxu1  ;;  %v1463_v62 = vpop.f32.mrf.mxu2 }
 0x222   : > { %v2366_v63 = vadd.f32 %v834_v61, %v750_v55 }
 0x223   : > { %v1982_v45 = vpop.trf.xlu2 }
 0x228   : > { %v1478_v1 = vpop.f32.mrf.mxu3  ;;  %1398 = vperm.xlu2 %1989, %v597_v36  }
 0x229   : > { %v836_v4 = vpop.f32.mrf.mxu1  ;;  %v1465_v5 = vpop.f32.mrf.mxu2 }
 0x22a   : > { %v2369_v8 = vadd.f32 %v836_v4, %v752_v0  ;;  %v1291_v52 = vpop.trf.xlu1 }
 0x22c   : > { %1906 = vmatmul.msk.bf16.vlgmr.msrb.gmra.mxu1 %vm636_vm3, %v1980_v44 }
 0x22d   : > { %1904 = vmatmul.msk.bf16.vlgmr.msrb.gmra.mxu0 %vm636_vm3, %v1980_v44 }
 0x231   : > { %v839_v12 = vpop.f32.mrf.mxu1 }
 0x232   : > { %v2377_v19 = vadd.f32 %v839_v12, %v755_v9 }
 0x23c   : > { %1907 = vmatmul.msk.bf16.gmra.mxu1 %vm636_vm3, %v1982_v45 }
 0x23d   : > { %v1483_v20 = vpop.permute.xlu2 %1482  ;;  %1905 = vmatmul.msk.bf16.gmra.mxu0 %vm636_vm3, %v1982_v45  ;;  %v841_v45 = vpop.f32.mrf.mxu1 }
 0x23e   : > { %v1485_v29 = vmul.f32 %v1483_v20, %v1463_v62  ;;  %v1486_v30 = vmul.f32 %v1483_v20, %v1476_v58 }
 0x240   : > { %v1491_v50 = vadd.f32 %v2318_v14, %v1485_v29  ;;  %v1492_v23 = vadd.f32 %v2318_v14, %v1486_v30  ;;  %v1498_v14 = vld [vmem:[%s2508_s6] sm:$0xff] }
 0x241   : > { %1501 = vperm.xlu0 %1985, %v1498_v14  }
 0x242   : > { %v1493_v17 = vmax.f32 %v1491_v50, 0.0  ;;  %v1494_v16 = vmax.f32 %v1492_v23, 0.0 }
 0x244   : > { %v1496_v34 = vpack.c.bf16 %v1493_v17, %v1493_v17  ;;  %v1497_v35 = vpack.c.bf16 %v1494_v16, %v1494_v16 }
 0x245   : > { %v2408_v17 = vpop.permute.xlu2 %1382 }
 0x246   : > { %v1524_v37 = vsel %vm643_vm14, %v1496_v34, 0  ;;  %v1527_v38 = vsel %vm643_vm14, %v1497_v35, 0 }
 0x247   : > { %1536 = vmatpush.bf16.msrb.mxu2 %v1524_v37  ;;  %1549 = vmatpush.bf16.msrb.mxu3 %v1527_v38 }
 0x24a   : > { %v659_v40 = vpop.f32.mrf.mxu0 }
 0x24b   : > { %v731_v62 = vadd.f32 %v2261_v43, %v659_v40 }
 0x24c   : > { %1916 = vmatmul.msk.bf16.vlgmr.msra.gmra.mxu1 %vm636_vm3, %v1290_v11 }
 0x24d   : > { %1914 = vmatmul.msk.bf16.vlgmr.msra.gmra.mxu0 %vm636_vm3, %v1290_v11 }
 0x252   : > { %v661_v44 = vpop.f32.mrf.mxu0 }
 0x253   : > { %v733_v27 = vadd.f32 %v2265_v46, %v661_v44 }
 0x258   : > { %v2412_v35 = vpop.permute.xlu2 %1402 }
 0x25a   : > { %v664_v55 = vpop.f32.mrf.mxu0 }
 0x25b   : > { %v1512_v58 = vpop.trf.xlu0  ;;  %v736_v42 = vadd.f32 %v2275_v51, %v664_v55 }
 0x25c   : > { %1917 = vmatmul.msk.bf16.gmra.mxu1 %vm636_vm3, %v1291_v52  ;;  %1920 = vmatmul.msk.bf16.vlgmr.msrb.gmra.mxu2 %vm636_vm3, %v1512_v58 }
 0x25d   : > { %1921 = vmatmul.msk.bf16.vlgmr.msrb.gmra.mxu3 %vm636_vm3, %v1512_v58  ;;  %1915 = vmatmul.msk.bf16.gmra.mxu0 %vm636_vm3, %v1291_v52  ;;  %v933_v52 = vadd.f32 %v2285_v56, %v2366_v63 }
 0x262   : > { %v666_v61 = vpop.f32.mrf.mxu0 }
 0x263   : > { %v738_v20 = vadd.f32 %v2282_v54, %v666_v61  ;;  %v2416_v54 = vpop.permute.xlu2 %1406 }
 0x26a   : > { %v815_v0 = vpop.f32.mrf.mxu0 }
 0x26b   : > { %v844_v1 = vadd.f32 %v815_v0, %v731_v62  ;;  %v1368_v40 = vpop.permute.xlu2 %1367 }
 0x26d   : > { %v932_v55 = vadd.f32 %v2287_v57, %v844_v1 }
 0x272   : > { %v817_v4 = vpop.f32.mrf.mxu0 }
 0x273   : > { %v846_v5 = vadd.f32 %v817_v4, %v733_v27  ;;  %v1373_v62 = vpop.permute.xlu2 %1372 }
 0x27a   : > { %v820_v9 = vpop.f32.mrf.mxu0 }
 0x27b   : > { %v848_v12 = vadd.f32 %v820_v9, %v736_v42  ;;  %v935_v9 = vadd.f32 %v2289_v59, %v2369_v8 }
 0x282   : > { %v822_v25 = vpop.f32.mrf.mxu0 }
 0x283   : > { %v2406_v29 = vadd.f32 %v822_v25, %v738_v20  ;;  %v934_v25 = vadd.f32 %v2291_v60, %v846_v5  ;;  %v937_v60 = vadd.f32 %v2301_v2, %v2377_v19 }
 0x289   : > { %v1007_v30 = vpop.f32.mrf.mxu1 }
 0x28a   : > { %v988_v50 = vpop.f32.mrf.mxu0  ;;  %v1018_v58 = vadd.f32 %v1007_v30, %v933_v52  ;;  %v1395_v52 = vpop.permute.xlu2 %1394 }
 0x28b   : > { %v1017_v61 = vadd.f32 %v988_v50, %v932_v55 }
 0x28c   : > { %v1103_v27 = vadd.f32 %v2312_v10, %v1018_v58 }
 0x28d   : > { %v1102_v42 = vadd.f32 %v2315_v13, %v1017_v61 }
 0x291   : > { %v1009_v23 = vpop.f32.mrf.mxu1 }
 0x292   : > { %v990_v43 = vpop.f32.mrf.mxu0  ;;  %v1020_v63 = vadd.f32 %v1009_v23, %v935_v9  ;;  %v936_v23 = vadd.f32 %v2303_v3, %v848_v12 }
 0x293   : > { %v1019_v57 = vadd.f32 %v990_v43, %v934_v25 }
 0x294   : > { %v1105_v10 = vadd.f32 %v2320_v15, %v1020_v63 }
 0x295   : > { %v1104_v58 = vadd.f32 %v2325_v18, %v1019_v57 }
 0x299   : > { %v1012_v16 = vpop.f32.mrf.mxu1 }
 0x29a   : > { %v993_v46 = vpop.f32.mrf.mxu0 }
 0x29b   : > { %v1021_v15 = vadd.f32 %v993_v46, %v936_v23  ;;  %v1399_v46 = vpop.permute.xlu2 %1398 }
 0x29d   : > { %v1106_v12 = vadd.f32 %v2332_v24, %v1021_v15 }
 0x2a1   : > { %v2410_v34 = vpop.f32.mrf.mxu1 }
 0x2a2   : > { %v2414_v51 = vpop.f32.mrf.mxu0 }
 0x2a9   : > { %v1177_v36 = vpop.f32.mrf.mxu1 }
 0x2aa   : > { %v1158_v37 = vpop.f32.mrf.mxu0  ;;  %v1188_v20 = vadd.f32 %v1177_v36, %v1103_v27  ;;  %v1022_v36 = vadd.f32 %v1012_v16, %v937_v60 }
 0x2ab   : > { %v1187_v56 = vadd.f32 %v1158_v37, %v1102_v42 }
 0x2ac   : > { %v1273_v1 = vadd.f32 %v2340_v31, %v1188_v20  ;;  %v1107_v3 = vadd.f32 %v2330_v22, %v1022_v36 }
 0x2ad   : > { %v1272_v50 = vadd.f32 %v2342_v32, %v1187_v56  ;;  %v757_v32 = vadd.f32 %v2280_v53, %v2359_v48 }
 0x2af   : > { %v851_v27 = vadd.f32 %v841_v45, %v757_v32 }
 0x2b1   : > { %v1179_v38 = vpop.f32.mrf.mxu1 }
 0x2b2   : > { %v1160_v11 = vpop.f32.mrf.mxu0  ;;  %v1190_v8 = vadd.f32 %v1179_v38, %v1105_v10 }
 0x2b3   : > { %v1189_v31 = vadd.f32 %v1160_v11, %v1104_v58 }
 0x2b4   : > { %v1275_v42 = vadd.f32 %v2344_v33, %v1190_v8  ;;  %v939_v33 = vadd.f32 %v2306_v6, %v851_v27 }
 0x2b5   : > { %v1274_v19 = vadd.f32 %v2346_v21, %v1189_v31  ;;  %v938_v21 = vadd.f32 %v2308_v7, %v2406_v29  ;;  %v1378_v29 = vpop.permute.xlu1 %1377 }
 0x2b6   : > { %v1024_v20 = vadd.f32 %v2410_v34, %v939_v33 }
 0x2b7   : > { %v1023_v25 = vadd.f32 %v2414_v51, %v938_v21 }
 0x2b9   : > { %v1182_v14 = vpop.f32.mrf.mxu1 }
 0x2ba   : > { %v1163_v44 = vpop.f32.mrf.mxu0  ;;  %v1192_v38 = vadd.f32 %v1182_v14, %v1107_v3  ;;  %v1109_v14 = vadd.f32 %v2335_v26, %v1024_v20 }
 0x2bb   : > { %v1191_v11 = vadd.f32 %v1163_v44, %v1106_v12  ;;  %v1108_v44 = vadd.f32 %v2337_v28, %v1023_v25 }
 0x2bc   : > { %v1277_v57 = vadd.f32 %v2352_v41, %v1192_v38 }
 0x2bd   : > { %v1276_v7 = vadd.f32 %v2354_v39, %v1191_v11 }
 0x2c1   : > { %v2421_v0 = vpop.f32.mrf.mxu1 }
 0x2c2   : > { %v2424_v4 = vpop.f32.mrf.mxu0 }
 0x2c9   : > { %v1347_v30 = vpop.f32.mrf.mxu1 }
 0x2ca   : > { %v1358_v55 = vadd.f32 %v1347_v30, %v1273_v1  ;;  %v1328_v13 = vpop.f32.mrf.mxu0 }
 0x2cb   : > { %v1357_v59 = vadd.f32 %v1328_v13, %v1272_v50  ;;  %v1194_v50 = vadd.f32 %v2421_v0, %v1109_v14  ;;  %v1502_v13 = vpop.permute.xlu0 %1501 }
 0x2cc   : > { %v1386_v5 = vmul.f32 %v1368_v40, %v1358_v55 }
 0x2cd   : > { %v1385_v43 = vmul.f32 %v1368_v40, %v1357_v59  ;;  %v1279_v31 = vadd.f32 %v2357_v47, %v1194_v50 }
 0x2ce   : > { %v1410_v37 = vadd.f32 %v1395_v52, %v1386_v5 }
 0x2cf   : > { %v1409_v61 = vadd.f32 %v1395_v52, %v1385_v43  ;;  %v1193_v52 = vadd.f32 %v2424_v4, %v1108_v44 }
 0x2d0   : > { %v1418_v18 = vmax.f32 %v1410_v37, 0.0 }
 0x2d1   : > { %v1417_v9 = vmax.f32 %v1409_v61, 0.0  ;;  %v1349_v2 = vpop.f32.mrf.mxu1  ;;  %v1278_v37 = vadd.f32 %v2361_v49, %v1193_v52 }
 0x2d2   : > { %v1360_v53 = vadd.f32 %v1349_v2, %v1275_v42  ;;  %v1330_v48 = vpop.f32.mrf.mxu0 }
 0x2d3   : > { %v1425_v45 = vpack.c.bf16 %v1418_v18, %v1417_v9  ;;  %v1359_v16 = vadd.f32 %v1330_v48, %v1274_v19 }
 0x2d4   : > { %v1388_v22 = vmul.f32 %v1373_v62, %v1360_v53 }
 0x2d5   : > { %1429 = vst [vmem:[%s2446_s27] sm:$0xff] %v1425_v45  ;;  %v1387_v40 = vmul.f32 %v1373_v62, %v1359_v16  ;;  %v1575_v41 = vunpack.c.l.b16 %v1425_v45  ;;  %v1576_v58 = vunpack.c.h.b16 %v1425_v45 }
 0x2d6   : > { %v1412_v56 = vadd.f32 %v1399_v46, %v1388_v22 }
 0x2d7   : > { %v1411_v63 = vadd.f32 %v1399_v46, %v1387_v40 }
 0x2d8   : > { %v1420_v24 = vmax.f32 %v1412_v56, 0.0 }
 0x2d9   : > { %v1419_v6 = vmax.f32 %v1411_v63, 0.0  ;;  %v1352_v1 = vpop.f32.mrf.mxu1 }
 0x2da   : > { %v1362_v62 = vadd.f32 %v1352_v1, %v1277_v57  ;;  %v1333_v34 = vpop.f32.mrf.mxu0  ;;  %v1940_v57 = vld [vmem:[%s2509_s7] sm:$0xff] }
 0x2db   : > { %v1426_v30 = vpack.c.bf16 %v1420_v24, %v1419_v6  ;;  %v1361_v51 = vadd.f32 %v1333_v34, %v1276_v7  ;;  %v1941_v24 = vld [vmem:[%s2509_s7 + $0x8] sm:$0xff]  ;;  %v1942_v6 = vld [vmem:[%s2511_s9] sm:$0xff] }
 0x2dc   : > { %v1390_v10 = vmul.f32 %v1378_v29, %v1362_v62  ;;  %1660 = vmatpush.bf16.msra.mxu2 %v1941_v24  ;;  %1693 = vmatpush.bf16.msra.mxu3 %v1942_v6 }
 0x2dd   : > { %1430 = vst [vmem:[%s2446_s27 + $0x8] sm:$0xff] %v1426_v30  ;;  %v1389_v55 = vmul.f32 %v1378_v29, %v1361_v51  ;;  %v1577_v39 = vunpack.c.l.b16 %v1426_v30  ;;  %v1578_v59 = vunpack.c.h.b16 %v1426_v30 }
 0x2de   : > { %v1414_v26 = vadd.f32 %v2412_v35, %v1390_v10 }
 0x2df   : > { %v1413_v28 = vadd.f32 %v2412_v35, %v1389_v55  ;;  %v1538_v0 = vpop.f32.mrf.mxu2  ;;  %v1583_v60 = vpack.c.b16 %v1577_v39, %v1575_v41  ;;  %v1584_v4 = vpack.c.b16 %v1578_v59, %v1576_v58 }
 0x2e0   : > { %v1422_v8 = vmax.f32 %v1414_v26, 0.0  ;;  %v1551_v5 = vpop.f32.mrf.mxu3  ;;  %v1539_v23 = vadd.f32 %v1538_v0, %v1502_v13  ;;  %1661 = vmatpush.bf16.msra.mxu2 %v1940_v57  ;;  %v1633_v26 = vld [vmem:[%s2510_s8] sm:$0x3] }
 0x2e1   : > { %v1421_v43 = vmax.f32 %v1413_v28, 0.0  ;;  %v1552_v32 = vadd.f32 %v1551_v5, %v1502_v13  ;;  %v1354_v36 = vpop.f32.mrf.mxu1  ;;  %v1667_v28 = vperm.slane %v1633_v26, 0  ;;  %v1669_v0 = vperm.slane %v1633_v26, 1 }
 0x2e2   : > { %1555 = vst [vmem:[%s492_s17] sm:$0xff] %v1539_v23  ;;  %v1364_v35 = vadd.f32 %v1354_v36, %v1279_v31  ;;  %v1335_v15 = vpop.f32.mrf.mxu0 }
 0x2e3   : > { %v1427_v61 = vpack.c.bf16 %v1422_v8, %v1421_v43  ;;  %1556 = vst [vmem:[%s492_s17 + $0x8] sm:$0xff] %v1552_v32  ;;  %v1363_v27 = vadd.f32 %v1335_v15, %v1278_v37  ;;  %v1557_v18 = vmax.f32 %v1539_v23, %v1552_v32 }
 0x2e4   : > { %v1392_v42 = vmul.f32 %v2408_v17, %v1364_v35 }
 0x2e5   : > { %1431 = vst [vmem:[%s2446_s27 + $0x10] sm:$0xff] %v1427_v61  ;;  %v1391_v9 = vmul.f32 %v2408_v17, %v1363_v27  ;;  %1558 = vmax.xlane.f32.xlu2 %v1557_v18  ;;  %v1579_v12 = vunpack.c.l.b16 %v1427_v61  ;;  %v1580_v16 = vunpack.c.h.b16 %v1427_v61 }
 0x2e6   : > { %v1416_v47 = vadd.f32 %v2416_v54, %v1392_v42 }
 0x2e7   : > { %v1415_v2 = vadd.f32 %v2416_v54, %v1391_v9  ;;  %v1540_v19 = vpop.f32.mrf.mxu2 }
 0x2e8   : > { %v1424_v49 = vmax.f32 %v1416_v47, 0.0  ;;  %v1553_v3 = vpop.f32.mrf.mxu3 }
 0x2e9   : > { %v1423_v53 = vmax.f32 %v1415_v2, 0.0 }
 0x2eb   : > { %v1428_v48 = vpack.c.bf16 %v1424_v49, %v1423_v53 }
 0x2ed   : > { %1432 = vst [vmem:[%s2446_s27 + $0x18] sm:$0xff] %v1428_v48  ;;  %v1581_v45 = vunpack.c.l.b16 %v1428_v48  ;;  %v1582_v46 = vunpack.c.h.b16 %v1428_v48  ;;  %s1872_s27 = sshll.u32 %s2522_s30, 2 }
 0x2ee   : > { %s500_s16 = scalar_lea.vmem %s2516_s14, %s1872_s27  ;;  %s496_s30 = scalar_lea.vmem %s2515_s13, %s1872_s27 }
 0x2ef   : > { %v1585_v33 = vpack.c.b16 %v1581_v45, %v1579_v12  ;;  %v1586_v21 = vpack.c.b16 %v1582_v46, %v1580_v16 }
 0x2f1   : > { %1597 = vmatpush.bf16.xpose.msrb.mxu0 %v1585_v33  ;;  %1610 = vmatpush.bf16.xpose.msrb.mxu1 %v1586_v21 }
 0x2f9   : > { %1598 = vmatpush.bf16.xpose.msrb.mxu0 %v1583_v60  ;;  %1611 = vmatpush.bf16.xpose.msrb.mxu1 %v1584_v4 }
 0x358   : > { %v1559_v17 = vpop.xlane.xlu2 %1558 }
 0x359   : > { %v1560_v38 = vsub.f32 %v1539_v23, %v1559_v17  ;;  %v1561_v22 = vsub.f32 %v1552_v32, %v1559_v17  ;;  %v1672_v32 = vld [vmem:[%s2512_s10] sm:$0x3] }
 0x35a   : > { %v1699_v36 = vperm.slane %v1672_v32, 0  ;;  %v1701_v37 = vperm.slane %v1672_v32, 1 }
 0x35b   : > { %v1562_v54 = vmul.f32 1.442695, %v1560_v38  ;;  %v1564_v11 = vmul.f32 1.442695, %v1561_v22 }
 0x35d   : > { %1990 = vpow2.f32 %v1562_v54 }
 0x35e   : > { %1992 = vpow2.f32 %v1564_v11 }
 0x363   : > { %v1991_v40 = vpop.eup %1990 }
 0x364   : > { %v1993_v20 = vpop.eup %1992  ;;  %v1569_v25 = vpack.c.bf16 %v1991_v40, %v1991_v40 }
 0x365   : > { %v1566_v56 = vadd.f32 %v1993_v20, %v1991_v40  ;;  %v1570_v63 = vpack.c.bf16 %v1993_v20, %v1993_v20 }
 0x366   : > { %1599 = vmatmul.bf16.vlgmr.msrb.gmra.mxu0 %v1569_v25 }
 0x367   : > { %1567 = vadd.xlane.f32.xlu0 %v1566_v56  ;;  %1612 = vmatmul.bf16.vlgmr.msrb.gmra.mxu1 %v1570_v63 }
 0x3da   : > { %v1568_v1 = vpop.xlane.xlu0 %1567 }
 0x3db   : > { %1994 = vrcp.f32 %v1568_v1  ;;  %v1628_v34 = vand.u32 2147483648, %v1568_v1  ;;  %v1626_v51 = vand.u32 2147483647, %v1568_v1  ;;  %vm1622_vm12 = vweird.f32 %v1568_v1 }
 0x3dd   : > { %v1629_v52 = vor.u32 1.1754944e-38, %v1628_v34  ;;  %vm1627_vm14 = vcmp.eq.f32.partialorder %v1626_v51, 8.507059e+37 }
 0x3e1   : > { %v1995_v7 = vpop.eup %1994 }
 0x3e2   : > { %v1618_v29 = vmul.f32 %v1995_v7, %v1568_v1  ;;  %vm1623_vm11 = vweird.f32 %v1995_v7 }
 0x3e3   : > { %v1600_v14 = vpop.f32.mrf.mxu0  ;;  %vm1624_vm13 = vmor %vm1622_vm12, %vm1623_vm11 }
 0x3e4   : > { %v1619_v44 = vsub.f32 1.0, %v1618_v29  ;;  %v1613_v62 = vpop.f32.mrf.mxu1 }
 0x3e5   : > { %v1614_v10 = vadd.f32 %v1613_v62, %v1600_v14 }
 0x3e6   : > { %v1620_v30 = vmul.f32 %v1995_v7, %v1619_v44 }
 0x3e8   : > { %v1621_v50 = vadd.f32 %v1995_v7, %v1620_v30 }
 0x3ea   : > { %v1625_v41 = vsel %vm1624_vm13, %v1995_v7, %v1621_v50 }
 0x3eb   : > { %v1630_v55 = vsel %vm1627_vm14, %v1629_v52, %v1625_v41  ;;  %v1602_v13 = vpop.f32.mrf.mxu0 }
 0x3ec   : > { %v1631_v39 = vmul.f32 %v1630_v55, %v1614_v10  ;;  %v1615_v58 = vpop.f32.mrf.mxu1 }
 0x3ee   : > { %v1632_v59 = vpack.c.bf16 %v1631_v39, %v1631_v39 }
 0x3f0   : > { %1930 = vmatmul.msk.bf16.vlgmr.msra.gmra.mxu2 %vm1650_vm15, %v1632_v59 }
 0x473   : > { %v1663_v60 = vpop.f32.mrf.mxu2 }
 0x474   : > { %v1668_v4 = vmul.f32 %v1667_v28, %v1663_v60 }
 0x476   : > { %v1670_v8 = vadd.f32 %v1669_v0, %v1668_v4 }
 0x478   : > { %v1671_v5 = vmax.f32 %v1670_v8, 0.0 }
 0x47a   : > { %v1673_v23 = vpack.c.bf16 %v1671_v5, %v1671_v5 }
 0x47b   : > { %v1665_v31 = vpop.f32.mrf.mxu2 }
 0x47c   : > { %1708 = vrot.lane.b32.xlu1 %v1673_v23, %s2006_s24  ;;  %1935 = vmatmul.msk.bf16.vlgmr.msra.gmra.mxu3 %vm1682_vm0, %v1673_v23 }
 0x4ee   : > { %v1709_v43 = vpop.permute.xlu1 %1708 }
 0x4ef   : > { %1711 = vst.msk [vmem:[%s500_s16] sm:$0xf] %vm1705_vm1, %v1709_v43 }
 0x4ff   : > { %v1695_v35 = vpop.f32.mrf.mxu3 }
 0x500   : > { %v1700_v15 = vmul.f32 %v1699_v36, %v1695_v35 }
 0x502   : > { %v1702_v61 = vadd.f32 %v1701_v37, %v1700_v15 }
 0x504   : > { %v1703_v27 = vmax.f32 %v1702_v61, 0.0 }
 0x506   : > { %v1704_v18 = vpack.c.bf16 %v1703_v27, %v1703_v27 }
 0x507   : > { %v1697_v42 = vpop.f32.mrf.mxu3 }
 0x508   : > { %1706 = vst.msk [vmem:[%s496_s30] sm:$0xf] %vm1705_vm1, %v1704_v18 }
 0x509 PF: > { %s25_s29 = sadd.s32 1, %s2002_s29  }
 0x50a   : > { %p22_p4 = scmp.ge.s32.totalorder %s25_s29, 4  }
 0x50c   :  { %24 = sbr.rel (!%p22_p4) target bundleno = 1 (0x1), region = 138 }

</bundles_post_ra>
